<compile_context>
chip_gen: v5e
topology: v5e:2x2
jax: 0.10.0
libtpu: 0.0.40
codegen_flags: <defaults>
</compile_context>

<pallas_src>
import functools

import jax
import jax.numpy as jnp
from jax.experimental import pallas as pl
from jax.experimental.pallas import tpu as pltpu


def _round_up(n, m):
    return ((n + m - 1) // m) * m


def _cdiv(a, b):
    return (a + b - 1) // b


def generator_kernel(x_ref, w1_ref, b1_ref, w2_ref, b2_ref, w3_ref, b3_ref,
                     o_ref):
    """Fused 3-layer MLP: (x@W1+b1)->lrelu->(@W2+b2)->lrelu->(@W3+b3)->tanh."""
    cdt = w1_ref.dtype            # MXU input dtype (bf16 or f32); acc is f32.
    x = x_ref[...]

    # Layer 1: Linear(in -> 256) + LeakyReLU(0.2)
    h1 = jnp.dot(x, w1_ref[...], preferred_element_type=jnp.float32) + b1_ref[...]
    h1 = jnp.maximum(h1, 0.2 * h1)

    # Layer 2: Linear(256 -> 512) + LeakyReLU(0.2)
    h2 = jnp.dot(h1.astype(cdt), w2_ref[...],
                 preferred_element_type=jnp.float32) + b2_ref[...]
    h2 = jnp.maximum(h2, 0.2 * h2)

    # Layer 3: Linear(512 -> 784) + Tanh
    h3 = jnp.dot(h2.astype(cdt), w3_ref[...],
                 preferred_element_type=jnp.float32) + b3_ref[...]
    o_ref[...] = jnp.tanh(h3).astype(o_ref.dtype)


def prepare_params(params, compute_dtype=jnp.bfloat16):
    """One-time weight prep (off the per-call critical path).

    Pads the contraction dim of W1 (100 -> 128 lanes, mathematically neutral)
    and casts weights to the MXU compute dtype.  Biases stay f32 so the
    elementwise path runs in f32 (required on v5e's VPU, better numerics).
    """
    cdt = jnp.dtype(compute_dtype)
    w1 = params["w1"]
    in_dim = w1.shape[0]
    in_p = _round_up(in_dim, 128)
    return {
        "w1": jnp.pad(w1, ((0, in_p - in_dim), (0, 0))).astype(cdt),
        "w2": params["w2"].astype(cdt),
        "w3": params["w3"].astype(cdt),
        "b1": params["b1"].astype(jnp.float32),
        "b2": params["b2"].astype(jnp.float32),
        "b3": params["b3"].astype(jnp.float32),
    }


@functools.partial(jax.jit, static_argnames=("block_m", "out_dtype"))
def generator_forward(x, prepared, block_m=1024, out_dtype=jnp.bfloat16):
    """Runs the fused Generator MLP on TPU via pallas_call.

    Args:
      x: [B, input_dim] float32 latent batch.
      prepared: output of prepare_params() (padded, compute-dtype weights).
      block_m: max batch tile size (multiple of 8).
      out_dtype: dtype of the stored output (default bf16; tanh is in [-1,1]).
    """
    w1, b1 = prepared["w1"], prepared["b1"]
    w2, b2 = prepared["w2"], prepared["b2"]
    w3, b3 = prepared["w3"], prepared["b3"]

    B, in_dim = x.shape
    in_p = w1.shape[0]
    h1_dim, h2_dim, out_dim = w1.shape[1], w2.shape[1], w3.shape[1]
    cdt = w1.dtype

    # Batch tiling: at least 2 tiles whenever there are >= 16 rows of work
    # (keeps both v7x TensorCores busy), and bm = round_up(ceil(B/n), 8) so a
    # batch just above a tile boundary doesn't pad a whole dead tile.
    B8 = _round_up(B, 8)
    n_tiles = _cdiv(B8, block_m)
    if n_tiles == 1 and B8 >= 16:
        n_tiles = 2
    bm = _round_up(_cdiv(B8, n_tiles), 8)
    n_tiles = _cdiv(B8, bm)
    Bp = n_tiles * bm

    # Per-call input prep: batch pad + lane-pad the contraction (100 -> 128)
    # + cast to the compute dtype.  Weights were prepared once, off this path.
    xp = jnp.pad(x, ((0, Bp - B), (0, in_p - in_dim))).astype(cdt)

    x_spec = pl.BlockSpec((bm, in_p), lambda i: (i, 0))
    full = lambda shape: pl.BlockSpec(shape, lambda i: (0, 0))
    # 784 == full last dim of the output array -> legal block shape, so the
    # kernel stores the true width directly (no lane padding, no de-pad copy).
    out_spec = pl.BlockSpec((bm, out_dim), lambda i: (i, 0))

    # Advisory cost hint for XLA's scheduler around the custom call.
    flops = 2 * Bp * (in_p * h1_dim + h1_dim * h2_dim + h2_dim * out_dim)
    param_bytes = sum(int(a.size) * a.dtype.itemsize
                      for a in (w1, b1, w2, b2, w3, b3))
    bytes_accessed = (int(xp.size) * xp.dtype.itemsize + param_bytes
                      + Bp * out_dim * jnp.dtype(out_dtype).itemsize)

    out = pl.pallas_call(
        generator_kernel,
        out_shape=jax.ShapeDtypeStruct((Bp, out_dim), out_dtype),
        grid_spec=pl.GridSpec(
            grid=(n_tiles,),
            in_specs=[
                x_spec,
                full(w1.shape), full(b1.shape),
                full(w2.shape), full(b2.shape),
                full(w3.shape), full(b3.shape),
            ],
            out_specs=out_spec,
        ),
        compiler_params=pltpu.CompilerParams(
            dimension_semantics=("parallel",),
            vmem_limit_bytes=40 * 1024 * 1024),
        cost_estimate=pl.CostEstimate(
            flops=flops,
            transcendentals=Bp * out_dim,   # tanh
            bytes_accessed=bytes_accessed),
    )(xp, w1, b1, w2, b2, w3, b3)

    # Only (rare) batch padding needs stripping; the lane dim is exact.
    return out if Bp == B else out[:B]


def init_params(key, input_dim=100, output_dim=784):
    """Deterministic init mimicking PyTorch Linear default (+/- 1/sqrt(fan_in))."""
    dims = [(input_dim, 256), (256, 512), (512, output_dim)]
    params = {}
    for idx, (fan_in, fan_out) in enumerate(dims, start=1):
        key, kw, kb = jax.random.split(key, 3)
        bound = 1.0 / (fan_in ** 0.5)
        params[f"w{idx}"] = jax.random.uniform(
            kw, (fan_in, fan_out), jnp.float32, -bound, bound)
        params[f"b{idx}"] = jax.random.uniform(
            kb, (1, fan_out), jnp.float32, -bound, bound)
    return params


def generator_ref(x, params):
    """Pure-JAX reference for correctness check."""
    lrelu = lambda v: jnp.maximum(v, 0.2 * v)
    h = lrelu(x @ params["w1"] + params["b1"])
    h = lrelu(h @ params["w2"] + params["b2"])
    return jnp.tanh(h @ params["w3"] + params["b3"])


if __name__ == "__main__":
    key = jax.random.PRNGKey(0)
    key, kx = jax.random.split(key)

    B, input_dim, output_dim = 8, 100, 784
    x = jax.random.normal(kx, (B, input_dim), jnp.float32)
    params = init_params(key, input_dim=input_dim, output_dim=output_dim)
    ref = generator_ref(x, params)

    # Exact path: f32 compute + f32 store, tight tolerance vs. reference.
    prep_f32 = prepare_params(params, compute_dtype=jnp.float32)
    out_f32 = jax.block_until_ready(
        generator_forward(x, prep_f32, out_dtype=jnp.float32))
    assert out_f32.shape == (B, output_dim), out_f32.shape
    assert jnp.allclose(out_f32, ref, atol=1e-5, rtol=1e-5), \
        float(jnp.max(jnp.abs(out_f32 - ref)))

    # Default fast path: bf16 compute + bf16 store (f32 accumulation).
    prep_bf16 = prepare_params(params)
    out_bf16 = jax.block_until_ready(generator_forward(x, prep_bf16))
    assert out_bf16.shape == (B, output_dim), out_bf16.shape
    assert out_bf16.dtype == jnp.bfloat16, out_bf16.dtype
    err = jnp.max(jnp.abs(out_bf16.astype(jnp.float32) - ref))
    assert float(err) < 4e-2, float(err)

    print("KERNEL_OK")
</pallas_src>

<mosaic_0001>
module attributes {stable_mosaic.version = 11 : i64} {
  func.func @generator_kernel(%arg0: i32, %arg1: memref<8x128xf32, #tpu.memory_space<vmem>>, %arg2: memref<128x256xf32, #tpu.memory_space<vmem>>, %arg3: memref<1x256xf32, #tpu.memory_space<vmem>>, %arg4: memref<256x512xf32, #tpu.memory_space<vmem>>, %arg5: memref<1x512xf32, #tpu.memory_space<vmem>>, %arg6: memref<512x784xf32, #tpu.memory_space<vmem>>, %arg7: memref<1x784xf32, #tpu.memory_space<vmem>>, %arg8: memref<8x784xf32, #tpu.memory_space<vmem>>) attributes {dimension_semantics = [#tpu.dimension_semantics<parallel>], iteration_bounds = array<i64: 1>, scalar_prefetch = 0 : i64, scratch_operands = 0 : i64, tpu.core_type = #tpu.core_type<tc>, window_params = [{transform_indices = @transform_0, window_bounds = array<i64: 8, 128>}, {pipeline_mode = #tpu.pipeline_mode<synchronous>, transform_indices = @transform_1, window_bounds = array<i64: 128, 256>}, {pipeline_mode = #tpu.pipeline_mode<synchronous>, transform_indices = @transform_2, window_bounds = array<i64: 1, 256>}, {pipeline_mode = #tpu.pipeline_mode<synchronous>, transform_indices = @transform_3, window_bounds = array<i64: 256, 512>}, {pipeline_mode = #tpu.pipeline_mode<synchronous>, transform_indices = @transform_4, window_bounds = array<i64: 1, 512>}, {pipeline_mode = #tpu.pipeline_mode<synchronous>, transform_indices = @transform_5, window_bounds = array<i64: 512, 784>}, {pipeline_mode = #tpu.pipeline_mode<synchronous>, transform_indices = @transform_6, window_bounds = array<i64: 1, 784>}, {transform_indices = @transform_7, window_bounds = array<i64: 8, 784>}]} {
    %c0 = arith.constant 0 : index
    %c0_0 = arith.constant 0 : index
    %0 = vector.load %arg1[%c0, %c0_0] : memref<8x128xf32, #tpu.memory_space<vmem>>, vector<8x128xf32>
    %c0_1 = arith.constant 0 : index
    %c0_2 = arith.constant 0 : index
    %1 = vector.load %arg2[%c0_1, %c0_2] : memref<128x256xf32, #tpu.memory_space<vmem>>, vector<128x256xf32>
    %cst = arith.constant dense<0.000000e+00> : vector<8x256xf32>
    %2 = tpu.matmul %0, %1, %cst {dimension_numbers = #tpu.dot_dimension_numbers<[1], [0], [0], [1], [0, 0, 1, 1], [], []>} : vector<8x128xf32>, vector<128x256xf32>, vector<8x256xf32> -> vector<8x256xf32>
    %c0_3 = arith.constant 0 : index
    %c0_4 = arith.constant 0 : index
    %3 = vector.load %arg3[%c0_3, %c0_4] : memref<1x256xf32, #tpu.memory_space<vmem>>, vector<1x256xf32>
    %4 = vector.broadcast %3 : vector<1x256xf32> to vector<8x256xf32>
    %5 = arith.addf %2, %4 : vector<8x256xf32>
    %cst_5 = arith.constant 2.000000e-01 : f32
    %6 = vector.broadcast %cst_5 : f32 to vector<8x256xf32>
    %7 = arith.mulf %6, %5 : vector<8x256xf32>
    %8 = arith.maximumf %5, %7 : vector<8x256xf32>
    %c0_6 = arith.constant 0 : index
    %c0_7 = arith.constant 0 : index
    %9 = vector.load %arg4[%c0_6, %c0_7] : memref<256x512xf32, #tpu.memory_space<vmem>>, vector<256x512xf32>
    %cst_8 = arith.constant dense<0.000000e+00> : vector<8x512xf32>
    %10 = tpu.matmul %8, %9, %cst_8 {dimension_numbers = #tpu.dot_dimension_numbers<[1], [0], [0], [1], [0, 0, 1, 1], [], []>} : vector<8x256xf32>, vector<256x512xf32>, vector<8x512xf32> -> vector<8x512xf32>
    %c0_9 = arith.constant 0 : index
    %c0_10 = arith.constant 0 : index
    %11 = vector.load %arg5[%c0_9, %c0_10] : memref<1x512xf32, #tpu.memory_space<vmem>>, vector<1x512xf32>
    %12 = vector.broadcast %11 : vector<1x512xf32> to vector<8x512xf32>
    %13 = arith.addf %10, %12 : vector<8x512xf32>
    %cst_11 = arith.constant 2.000000e-01 : f32
    %14 = vector.broadcast %cst_11 : f32 to vector<8x512xf32>
    %15 = arith.mulf %14, %13 : vector<8x512xf32>
    %16 = arith.maximumf %13, %15 : vector<8x512xf32>
    %c0_12 = arith.constant 0 : index
    %c0_13 = arith.constant 0 : index
    %17 = vector.load %arg6[%c0_12, %c0_13] : memref<512x784xf32, #tpu.memory_space<vmem>>, vector<512x784xf32>
    %cst_14 = arith.constant dense<0.000000e+00> : vector<8x784xf32>
    %18 = tpu.matmul %16, %17, %cst_14 {dimension_numbers = #tpu.dot_dimension_numbers<[1], [0], [0], [1], [0, 0, 1, 1], [], []>} : vector<8x512xf32>, vector<512x784xf32>, vector<8x784xf32> -> vector<8x784xf32>
    %c0_15 = arith.constant 0 : index
    %c0_16 = arith.constant 0 : index
    %19 = vector.load %arg7[%c0_15, %c0_16] : memref<1x784xf32, #tpu.memory_space<vmem>>, vector<1x784xf32>
    %20 = vector.broadcast %19 : vector<1x784xf32> to vector<8x784xf32>
    %21 = arith.addf %18, %20 : vector<8x784xf32>
    %22 = math.tanh %21 : vector<8x784xf32>
    %c0_17 = arith.constant 0 : index
    %c0_18 = arith.constant 0 : index
    %23 = vector.load %arg8[%c0_17, %c0_18] : memref<8x784xf32, #tpu.memory_space<vmem>>, vector<8x784xf32>
    tpu.vector_store %arg8[%c0_17, %c0_18], %22 {strides = array<i32>} : memref<8x784xf32, #tpu.memory_space<vmem>>, vector<8x784xf32>,
    return
  }
  func.func @transform_0(%arg0: i32) -> (i32, i32) {
    %c0_i32 = arith.constant 0 : i32
    %c0_i32_0 = arith.constant 0 : i32
    return %arg0, %c0_i32 : i32, i32
  }
  func.func @transform_1(%arg0: i32) -> (i32, i32) {
    %c0_i32 = arith.constant 0 : i32
    %c0_i32_0 = arith.constant 0 : i32
    %c0_i32_1 = arith.constant 0 : i32
    return %c0_i32, %c0_i32_0 : i32, i32
  }
  func.func @transform_2(%arg0: i32) -> (i32, i32) {
    %c0_i32 = arith.constant 0 : i32
    %c0_i32_0 = arith.constant 0 : i32
    %c0_i32_1 = arith.constant 0 : i32
    return %c0_i32, %c0_i32_0 : i32, i32
  }
  func.func @transform_3(%arg0: i32) -> (i32, i32) {
    %c0_i32 = arith.constant 0 : i32
    %c0_i32_0 = arith.constant 0 : i32
    %c0_i32_1 = arith.constant 0 : i32
    return %c0_i32, %c0_i32_0 : i32, i32
  }
  func.func @transform_4(%arg0: i32) -> (i32, i32) {
    %c0_i32 = arith.constant 0 : i32
    %c0_i32_0 = arith.constant 0 : i32
    %c0_i32_1 = arith.constant 0 : i32
    return %c0_i32, %c0_i32_0 : i32, i32
  }
  func.func @transform_5(%arg0: i32) -> (i32, i32) {
    %c0_i32 = arith.constant 0 : i32
    %c0_i32_0 = arith.constant 0 : i32
    %c0_i32_1 = arith.constant 0 : i32
    return %c0_i32, %c0_i32_0 : i32, i32
  }
  func.func @transform_6(%arg0: i32) -> (i32, i32) {
    %c0_i32 = arith.constant 0 : i32
    %c0_i32_0 = arith.constant 0 : i32
    %c0_i32_1 = arith.constant 0 : i32
    return %c0_i32, %c0_i32_0 : i32, i32
  }
  func.func @transform_7(%arg0: i32) -> (i32, i32) {
    %c0_i32 = arith.constant 0 : i32
    %c0_i32_0 = arith.constant 0 : i32
    return %arg0, %c0_i32 : i32, i32
  }
}

</mosaic_0001>

<bundles_post_ra>
// kernel: generator_forward.1
= control target key start
LH: loop header
LB: loop body
LE: loop exit
PB: predicated region body
PF: predicated region fallthrough
CT: control target
= control target key end

     0   :  { %s3437_s0 = inlined_call_operand.vmem [shape: f32[8,128], index: 0, kind: input, shape index: {}]   ;;  %s3438_s1 = inlined_call_operand.vmem [shape: f32[128,256], index: 1, kind: input, shape index: {}]   ;;  %s3439_s2 = inlined_call_operand.vmem [shape: f32[1,256], index: 2, kind: input, shape index: {}]   ;;  %s3440_s3 = inlined_call_operand.vmem [shape: f32[256,512], index: 3, kind: input, shape index: {}]   ;;  %s3441_s4 = inlined_call_operand.vmem [shape: f32[1,512], index: 4, kind: input, shape index: {}]   ;;  %s3442_s5 = inlined_call_operand.vmem [shape: f32[512,784], index: 5, kind: input, shape index: {}]   ;;  %s3443_s6 = inlined_call_operand.vmem [shape: f32[1,784], index: 6, kind: input, shape index: {}]   ;;  %s3444_s7 = inlined_call_operand.hbm [shape: f32[8,784], index: 7, kind: output, shape index: {}]  }
   0x1   :  { %v58_v0 = vld [vmem:[%s3438_s1 + $0xf0] sm:$0xff]  ;;  %v59_v1 = vld [vmem:[%s3438_s1 + $0xf8] sm:$0xff]  ;;  %v56_v2 = vld [vmem:[%s3438_s1 + $0xe0] sm:$0xff] }
   0x2   :  { %66 = vmatpush.msra.mxu0 %v58_v0  ;;  %86 = vmatpush.msra.mxu1 %v59_v1  ;;  %v57_v3 = vld [vmem:[%s3438_s1 + $0xe8] sm:$0xff]  ;;  %v54_v4 = vld [vmem:[%s3438_s1 + $0xd0] sm:$0xff]  ;;  %v55_v5 = vld [vmem:[%s3438_s1 + $0xd8] sm:$0xff] }
   0x3   :  { %v52_v6 = vld [vmem:[%s3438_s1 + $0xc0] sm:$0xff]  ;;  %v53_v7 = vld [vmem:[%s3438_s1 + $0xc8] sm:$0xff]  ;;  %v50_v8 = vld [vmem:[%s3438_s1 + $0xb0] sm:$0xff] }
   0x4   :  { %67 = vmatpush.msra.mxu0 %v56_v2  ;;  %87 = vmatpush.msra.mxu1 %v57_v3  ;;  %v51_v9 = vld [vmem:[%s3438_s1 + $0xb8] sm:$0xff]  ;;  %v48_v10 = vld [vmem:[%s3438_s1 + $0xa0] sm:$0xff]  ;;  %v49_v11 = vld [vmem:[%s3438_s1 + $0xa8] sm:$0xff] }
   0x5   :  { %v46_v12 = vld [vmem:[%s3438_s1 + $0x90] sm:$0xff]  ;;  %v47_v13 = vld [vmem:[%s3438_s1 + $0x98] sm:$0xff]  ;;  %v44_v14 = vld [vmem:[%s3438_s1 + $0x80] sm:$0xff] }
   0x6   :  { %68 = vmatpush.msra.mxu0 %v54_v4  ;;  %88 = vmatpush.msra.mxu1 %v55_v5  ;;  %v170_v15 = vld [vmem:[%s3440_s3 + $0x1e0] sm:$0xff]  ;;  %v45_v17 = vld [vmem:[%s3438_s1 + $0x88] sm:$0xff]  ;;  %v42_v21 = vld [vmem:[%s3438_s1 + $0x70] sm:$0xff] }
   0x7   :  { %v234_v16 = vld [vmem:[%s3440_s3 + $0x3e0] sm:$0xff]  ;;  %248 = vmatpush.msra.mxu2 %v170_v15  ;;  %v43_v22 = vld [vmem:[%s3438_s1 + $0x78] sm:$0xff]  ;;  %v41_v27 = vld [vmem:[%s3438_s1 + $0x68] sm:$0xff] }
   0x8   :  { %69 = vmatpush.msra.mxu0 %v52_v6  ;;  %89 = vmatpush.msra.mxu1 %v53_v7  ;;  %v166_v18 = vld [vmem:[%s3440_s3 + $0x1c0] sm:$0xff]  ;;  %v38_v30 = vld [vmem:[%s3438_s1 + $0x50] sm:$0xff]  ;;  %v39_v31 = vld [vmem:[%s3438_s1 + $0x58] sm:$0xff] }
   0x9   :  { %268 = vmatpush.msra.mxu3 %v234_v16  ;;  %v230_v19 = vld [vmem:[%s3440_s3 + $0x3c0] sm:$0xff]  ;;  %249 = vmatpush.msra.mxu2 %v166_v18  ;;  %v37_v35 = vld [vmem:[%s3438_s1 + $0x48] sm:$0xff]  ;;  %v34_v38 = vld [vmem:[%s3438_s1 + $0x30] sm:$0xff] }
   0xa   :  { %70 = vmatpush.msra.mxu0 %v50_v8  ;;  %90 = vmatpush.msra.mxu1 %v51_v9  ;;  %v162_v20 = vld [vmem:[%s3440_s3 + $0x1a0] sm:$0xff]  ;;  %v35_v39 = vld [vmem:[%s3438_s1 + $0x38] sm:$0xff]  ;;  %v33_v43 = vld [vmem:[%s3438_s1 + $0x28] sm:$0xff] }
   0xb   :  { %269 = vmatpush.msra.mxu3 %v230_v19  ;;  %v226_v23 = vld [vmem:[%s3440_s3 + $0x3a0] sm:$0xff]  ;;  %250 = vmatpush.msra.mxu2 %v162_v20  ;;  %v30_v46 = vld [vmem:[%s3438_s1 + $0x10] sm:$0xff]  ;;  %v31_v47 = vld [vmem:[%s3438_s1 + $0x18] sm:$0xff] }
   0xc   :  { %71 = vmatpush.msra.mxu0 %v48_v10  ;;  %91 = vmatpush.msra.mxu1 %v49_v11  ;;  %v158_v24 = vld [vmem:[%s3440_s3 + $0x180] sm:$0xff]  ;;  %v29_v51 = vld [vmem:[%s3438_s1 + $0x8] sm:$0xff] }
   0xd   :  { %v222_v25 = vld [vmem:[%s3440_s3 + $0x380] sm:$0xff]  ;;  %270 = vmatpush.msra.mxu3 %v226_v23  ;;  %251 = vmatpush.msra.mxu2 %v158_v24  ;;  %v171_v53 = vld [vmem:[%s3440_s3 + $0x1e8] sm:$0xff] }
   0xe   :  { %72 = vmatpush.msra.mxu0 %v46_v12  ;;  %92 = vmatpush.msra.mxu1 %v47_v13  ;;  %v40_v26 = vld [vmem:[%s3438_s1 + $0x60] sm:$0xff]  ;;  %v235_v54 = vld [vmem:[%s3440_s3 + $0x3e8] sm:$0xff] }
   0xf   :  { %v154_v28 = vld [vmem:[%s3440_s3 + $0x160] sm:$0xff]  ;;  %271 = vmatpush.msra.mxu3 %v222_v25  ;;  %v167_v57 = vld [vmem:[%s3440_s3 + $0x1c8] sm:$0xff] }
  0x10   :  { %73 = vmatpush.msra.mxu0 %v44_v14  ;;  %93 = vmatpush.msra.mxu1 %v45_v17  ;;  %v218_v29 = vld [vmem:[%s3440_s3 + $0x360] sm:$0xff]  ;;  %v231_v58 = vld [vmem:[%s3440_s3 + $0x3c8] sm:$0xff] }
  0x11   :  { %v150_v32 = vld [vmem:[%s3440_s3 + $0x140] sm:$0xff]  ;;  %252 = vmatpush.msra.mxu2 %v154_v28  ;;  %272 = vmatpush.msra.mxu3 %v218_v29  ;;  %v163_v61 = vld [vmem:[%s3440_s3 + $0x1a8] sm:$0xff] }
  0x12   :  { %74 = vmatpush.msra.mxu0 %v42_v21  ;;  %94 = vmatpush.msra.mxu1 %v43_v22  ;;  %v214_v33 = vld [vmem:[%s3440_s3 + $0x340] sm:$0xff]  ;;  %v227_v62 = vld [vmem:[%s3440_s3 + $0x3a8] sm:$0xff] }
  0x13   :  { %v36_v34 = vld [vmem:[%s3438_s1 + $0x40] sm:$0xff]  ;;  %253 = vmatpush.msra.mxu2 %v150_v32  ;;  %273 = vmatpush.msra.mxu3 %v214_v33  ;;  %v159_v1 = vld [vmem:[%s3440_s3 + $0x188] sm:$0xff] }
  0x14   :  { %75 = vmatpush.msra.mxu0 %v40_v26  ;;  %95 = vmatpush.msra.mxu1 %v41_v27  ;;  %v146_v36 = vld [vmem:[%s3440_s3 + $0x120] sm:$0xff]  ;;  %v223_v2 = vld [vmem:[%s3440_s3 + $0x388] sm:$0xff] }
  0x15   :  { %v210_v37 = vld [vmem:[%s3440_s3 + $0x320] sm:$0xff]  ;;  %254 = vmatpush.msra.mxu2 %v146_v36 }
  0x16   :  { %76 = vmatpush.msra.mxu0 %v38_v30  ;;  %96 = vmatpush.msra.mxu1 %v39_v31  ;;  %v142_v40 = vld [vmem:[%s3440_s3 + $0x100] sm:$0xff] }
  0x17   :  { %v206_v41 = vld [vmem:[%s3440_s3 + $0x300] sm:$0xff]  ;;  %274 = vmatpush.msra.mxu3 %v210_v37  ;;  %255 = vmatpush.msra.mxu2 %v142_v40 }
  0x18   :  { %77 = vmatpush.msra.mxu0 %v36_v34  ;;  %97 = vmatpush.msra.mxu1 %v37_v35  ;;  %v32_v42 = vld [vmem:[%s3438_s1 + $0x20] sm:$0xff] }
  0x19   :  { %v138_v44 = vld [vmem:[%s3440_s3 + $0xe0] sm:$0xff]  ;;  %275 = vmatpush.msra.mxu3 %v206_v41 }
  0x1a   :  { %78 = vmatpush.msra.mxu0 %v34_v38  ;;  %98 = vmatpush.msra.mxu1 %v35_v39  ;;  %v202_v45 = vld [vmem:[%s3440_s3 + $0x2e0] sm:$0xff] }
  0x1b   :  { %v134_v48 = vld [vmem:[%s3440_s3 + $0xc0] sm:$0xff]  ;;  %256 = vmatpush.msra.mxu2 %v138_v44  ;;  %276 = vmatpush.msra.mxu3 %v202_v45 }
  0x1c   :  { %79 = vmatpush.msra.mxu0 %v32_v42  ;;  %99 = vmatpush.msra.mxu1 %v33_v43  ;;  %v198_v49 = vld [vmem:[%s3440_s3 + $0x2c0] sm:$0xff] }
  0x1d   :  { %v28_v50 = vld [vmem:[%s3438_s1] sm:$0xff]  ;;  %257 = vmatpush.msra.mxu2 %v134_v48  ;;  %277 = vmatpush.msra.mxu3 %v198_v49 }
  0x1e   :  { %80 = vmatpush.msra.mxu0 %v30_v46  ;;  %100 = vmatpush.msra.mxu1 %v31_v47  ;;  %v27_v52 = vld [vmem:[%s3437_s0] sm:$0xff] }
  0x1f   :  { %v130_v55 = vld [vmem:[%s3440_s3 + $0xa0] sm:$0xff] }
  0x20   :  { %81 = vmatpush.msra.mxu0 %v28_v50  ;;  %101 = vmatpush.msra.mxu1 %v29_v51  ;;  %v194_v56 = vld [vmem:[%s3440_s3 + $0x2a0] sm:$0xff] }
  0x21   :  { %82 = vmatmul.f32.vlgmr.msra.gmra.mxu0 %v27_v52  ;;  %102 = vmatmul.f32.vlgmr.msra.gmra.mxu1 %v27_v52  ;;  %v126_v59 = vld [vmem:[%s3440_s3 + $0x80] sm:$0xff] }
  0x22   :  { %288 = vmatpush.msrb.mxu0 %v171_v53  ;;  %308 = vmatpush.msrb.mxu1 %v235_v54  ;;  %v190_v60 = vld [vmem:[%s3440_s3 + $0x280] sm:$0xff] }
  0x23   :  { %258 = vmatpush.msra.mxu2 %v130_v55  ;;  %278 = vmatpush.msra.mxu3 %v194_v56  ;;  %v122_v63 = vld [vmem:[%s3440_s3 + $0x60] sm:$0xff] }
  0x24   :  { %289 = vmatpush.msrb.mxu0 %v167_v57  ;;  %309 = vmatpush.msrb.mxu1 %v231_v58  ;;  %v186_v0 = vld [vmem:[%s3440_s3 + $0x260] sm:$0xff] }
  0x25   :  { %259 = vmatpush.msra.mxu2 %v126_v59  ;;  %279 = vmatpush.msra.mxu3 %v190_v60  ;;  %v118_v3 = vld [vmem:[%s3440_s3 + $0x40] sm:$0xff] }
  0x26   :  { %290 = vmatpush.msrb.mxu0 %v163_v61  ;;  %310 = vmatpush.msrb.mxu1 %v227_v62  ;;  %v182_v4 = vld [vmem:[%s3440_s3 + $0x240] sm:$0xff] }
  0x27   :  { %12 = vsyncpa [#allocation3], 0  ;;  %v155_v5 = vld [vmem:[%s3440_s3 + $0x168] sm:$0xff]  ;;  %260 = vmatpush.msra.mxu2 %v122_v63  ;;  %280 = vmatpush.msra.mxu3 %v186_v0  ;;  %v114_v7 = vld [vmem:[%s3440_s3 + $0x20] sm:$0xff]  ;;  %s1462_s16 = sshll.u32 %s3444_s7, 4  ;;  %vm1453_vm0 = vcmask 130048   ;;  %s1463_s16 = int_to_ptr.hbm [resolvable:$true] %s1462_s16 }
  0x28   :  { %v219_v6 = vld [vmem:[%s3440_s3 + $0x368] sm:$0xff]  ;;  %291 = vmatpush.msrb.mxu0 %v159_v1  ;;  %311 = vmatpush.msrb.mxu1 %v223_v2  ;;  %v178_v8 = vld [vmem:[%s3440_s3 + $0x220] sm:$0xff]  ;;  %v172_v15 = vld [vmem:[%s3440_s3 + $0x1f0] sm:$0xff] }
  0x29   :  { %v151_v9 = vld [vmem:[%s3440_s3 + $0x148] sm:$0xff]  ;;  %261 = vmatpush.msra.mxu2 %v118_v3  ;;  %281 = vmatpush.msra.mxu3 %v182_v4  ;;  %v110_v11 = vld [vmem:[%s3440_s3] sm:$0xff]  ;;  %v236_v16 = vld [vmem:[%s3440_s3 + $0x3f0] sm:$0xff] }
  0x2a   :  { %v215_v10 = vld [vmem:[%s3440_s3 + $0x348] sm:$0xff]  ;;  %292 = vmatpush.msrb.mxu0 %v155_v5  ;;  %312 = vmatpush.msrb.mxu1 %v219_v6  ;;  %v174_v12 = vld [vmem:[%s3440_s3 + $0x200] sm:$0xff]  ;;  %v168_v19 = vld [vmem:[%s3440_s3 + $0x1d0] sm:$0xff] }
  0x2b   :  { %v147_v13 = vld [vmem:[%s3440_s3 + $0x128] sm:$0xff]  ;;  %262 = vmatpush.msra.mxu2 %v114_v7  ;;  %282 = vmatpush.msra.mxu3 %v178_v8  ;;  %v232_v20 = vld [vmem:[%s3440_s3 + $0x3d0] sm:$0xff]  ;;  %v173_v49 = vld [vmem:[%s3440_s3 + $0x1f8] sm:$0xff] }
  0x2c   :  { %v211_v14 = vld [vmem:[%s3440_s3 + $0x328] sm:$0xff]  ;;  %293 = vmatpush.msrb.mxu0 %v151_v9  ;;  %313 = vmatpush.msrb.mxu1 %v215_v10  ;;  %v164_v23 = vld [vmem:[%s3440_s3 + $0x1b0] sm:$0xff]  ;;  %v237_v50 = vld [vmem:[%s3440_s3 + $0x3f8] sm:$0xff] }
  0x2d   :  { %v143_v17 = vld [vmem:[%s3440_s3 + $0x108] sm:$0xff]  ;;  %263 = vmatpush.msra.mxu2 %v110_v11  ;;  %283 = vmatpush.msra.mxu3 %v174_v12  ;;  %v228_v24 = vld [vmem:[%s3440_s3 + $0x3b0] sm:$0xff]  ;;  %v169_v51 = vld [vmem:[%s3440_s3 + $0x1d8] sm:$0xff] }
  0x2e   :  { %v207_v18 = vld [vmem:[%s3440_s3 + $0x308] sm:$0xff]  ;;  %294 = vmatpush.msrb.mxu0 %v147_v13  ;;  %314 = vmatpush.msrb.mxu1 %v211_v14  ;;  %v160_v27 = vld [vmem:[%s3440_s3 + $0x190] sm:$0xff]  ;;  %v233_v52 = vld [vmem:[%s3440_s3 + $0x3d8] sm:$0xff] }
  0x2f   :  { %v139_v21 = vld [vmem:[%s3440_s3 + $0xe8] sm:$0xff]  ;;  %328 = vmatpush.msrb.mxu2 %v172_v15  ;;  %348 = vmatpush.msrb.mxu3 %v236_v16  ;;  %v224_v28 = vld [vmem:[%s3440_s3 + $0x390] sm:$0xff]  ;;  %v165_v53 = vld [vmem:[%s3440_s3 + $0x1b8] sm:$0xff] }
  0x30   :  { %v203_v22 = vld [vmem:[%s3440_s3 + $0x2e8] sm:$0xff]  ;;  %295 = vmatpush.msrb.mxu0 %v143_v17  ;;  %315 = vmatpush.msrb.mxu1 %v207_v18  ;;  %v156_v31 = vld [vmem:[%s3440_s3 + $0x170] sm:$0xff]  ;;  %v229_v54 = vld [vmem:[%s3440_s3 + $0x3b8] sm:$0xff] }
  0x31   :  { %v135_v25 = vld [vmem:[%s3440_s3 + $0xc8] sm:$0xff]  ;;  %329 = vmatpush.msrb.mxu2 %v168_v19  ;;  %349 = vmatpush.msrb.mxu3 %v232_v20  ;;  %v220_v32 = vld [vmem:[%s3440_s3 + $0x370] sm:$0xff]  ;;  %v161_v55 = vld [vmem:[%s3440_s3 + $0x198] sm:$0xff] }
  0x32   :  { %v199_v26 = vld [vmem:[%s3440_s3 + $0x2c8] sm:$0xff]  ;;  %296 = vmatpush.msrb.mxu0 %v139_v21  ;;  %316 = vmatpush.msrb.mxu1 %v203_v22  ;;  %v152_v35 = vld [vmem:[%s3440_s3 + $0x150] sm:$0xff]  ;;  %v225_v56 = vld [vmem:[%s3440_s3 + $0x398] sm:$0xff] }
  0x33   :  { %v131_v29 = vld [vmem:[%s3440_s3 + $0xa8] sm:$0xff]  ;;  %330 = vmatpush.msrb.mxu2 %v164_v23  ;;  %350 = vmatpush.msrb.mxu3 %v228_v24  ;;  %v216_v36 = vld [vmem:[%s3440_s3 + $0x350] sm:$0xff]  ;;  %v157_v57 = vld [vmem:[%s3440_s3 + $0x178] sm:$0xff] }
  0x34   :  { %v195_v30 = vld [vmem:[%s3440_s3 + $0x2a8] sm:$0xff]  ;;  %297 = vmatpush.msrb.mxu0 %v135_v25  ;;  %317 = vmatpush.msrb.mxu1 %v199_v26  ;;  %v148_v39 = vld [vmem:[%s3440_s3 + $0x130] sm:$0xff]  ;;  %v221_v58 = vld [vmem:[%s3440_s3 + $0x378] sm:$0xff] }
  0x35   :  { %v127_v33 = vld [vmem:[%s3440_s3 + $0x88] sm:$0xff]  ;;  %331 = vmatpush.msrb.mxu2 %v160_v27  ;;  %351 = vmatpush.msrb.mxu3 %v224_v28  ;;  %v212_v40 = vld [vmem:[%s3440_s3 + $0x330] sm:$0xff]  ;;  %v153_v59 = vld [vmem:[%s3440_s3 + $0x158] sm:$0xff] }
  0x36   :  { %v191_v34 = vld [vmem:[%s3440_s3 + $0x288] sm:$0xff]  ;;  %298 = vmatpush.msrb.mxu0 %v131_v29  ;;  %318 = vmatpush.msrb.mxu1 %v195_v30  ;;  %v144_v43 = vld [vmem:[%s3440_s3 + $0x110] sm:$0xff]  ;;  %v217_v60 = vld [vmem:[%s3440_s3 + $0x358] sm:$0xff] }
  0x37   :  { %v123_v37 = vld [vmem:[%s3440_s3 + $0x68] sm:$0xff]  ;;  %332 = vmatpush.msrb.mxu2 %v156_v31  ;;  %352 = vmatpush.msrb.mxu3 %v220_v32  ;;  %v208_v44 = vld [vmem:[%s3440_s3 + $0x310] sm:$0xff]  ;;  %v149_v61 = vld [vmem:[%s3440_s3 + $0x138] sm:$0xff] }
  0x38   :  { %v187_v38 = vld [vmem:[%s3440_s3 + $0x268] sm:$0xff]  ;;  %299 = vmatpush.msrb.mxu0 %v127_v33  ;;  %319 = vmatpush.msrb.mxu1 %v191_v34  ;;  %v213_v62 = vld [vmem:[%s3440_s3 + $0x338] sm:$0xff]  ;;  %v140_v1 = vld [vmem:[%s3440_s3 + $0xf0] sm:$0xff] }
  0x39   :  { %v119_v41 = vld [vmem:[%s3440_s3 + $0x48] sm:$0xff]  ;;  %333 = vmatpush.msrb.mxu2 %v152_v35  ;;  %353 = vmatpush.msrb.mxu3 %v216_v36  ;;  %v145_v63 = vld [vmem:[%s3440_s3 + $0x118] sm:$0xff]  ;;  %v204_v2 = vld [vmem:[%s3440_s3 + $0x2f0] sm:$0xff] }
  0x3a   :  { %v183_v42 = vld [vmem:[%s3440_s3 + $0x248] sm:$0xff]  ;;  %300 = vmatpush.msrb.mxu0 %v123_v37  ;;  %320 = vmatpush.msrb.mxu1 %v187_v38  ;;  %v209_v0 = vld [vmem:[%s3440_s3 + $0x318] sm:$0xff]  ;;  %v136_v5 = vld [vmem:[%s3440_s3 + $0xd0] sm:$0xff] }
  0x3b   :  { %v115_v45 = vld [vmem:[%s3440_s3 + $0x28] sm:$0xff]  ;;  %334 = vmatpush.msrb.mxu2 %v148_v39  ;;  %354 = vmatpush.msrb.mxu3 %v212_v40  ;;  %v141_v3 = vld [vmem:[%s3440_s3 + $0xf8] sm:$0xff]  ;;  %v200_v6 = vld [vmem:[%s3440_s3 + $0x2d0] sm:$0xff] }
  0x3c   :  { %v179_v46 = vld [vmem:[%s3440_s3 + $0x228] sm:$0xff]  ;;  %301 = vmatpush.msrb.mxu0 %v119_v41  ;;  %321 = vmatpush.msrb.mxu1 %v183_v42  ;;  %v205_v4 = vld [vmem:[%s3440_s3 + $0x2f8] sm:$0xff]  ;;  %v132_v9 = vld [vmem:[%s3440_s3 + $0xb0] sm:$0xff] }
  0x3d   :  { %v111_v47 = vld [vmem:[%s3440_s3 + $0x8] sm:$0xff]  ;;  %335 = vmatpush.msrb.mxu2 %v144_v43  ;;  %355 = vmatpush.msrb.mxu3 %v208_v44  ;;  %v137_v7 = vld [vmem:[%s3440_s3 + $0xd8] sm:$0xff]  ;;  %v196_v10 = vld [vmem:[%s3440_s3 + $0x2b0] sm:$0xff] }
  0x3e   :  { %v175_v48 = vld [vmem:[%s3440_s3 + $0x208] sm:$0xff]  ;;  %302 = vmatpush.msrb.mxu0 %v115_v45  ;;  %322 = vmatpush.msrb.mxu1 %v179_v46  ;;  %v201_v8 = vld [vmem:[%s3440_s3 + $0x2d8] sm:$0xff]  ;;  %v128_v13 = vld [vmem:[%s3440_s3 + $0x90] sm:$0xff] }
  0x3f   :  { %336 = vmatpush.msrb.mxu2 %v140_v1  ;;  %356 = vmatpush.msrb.mxu3 %v204_v2  ;;  %v133_v11 = vld [vmem:[%s3440_s3 + $0xb8] sm:$0xff]  ;;  %v192_v14 = vld [vmem:[%s3440_s3 + $0x290] sm:$0xff]  ;;  %v60_v33 = vld [vmem:[%s3439_s2] sm:$0x3] }
  0x40   :  { %303 = vmatpush.msrb.mxu0 %v111_v47  ;;  %323 = vmatpush.msrb.mxu1 %v175_v48  ;;  %v197_v12 = vld [vmem:[%s3440_s3 + $0x2b8] sm:$0xff]  ;;  %v124_v17 = vld [vmem:[%s3440_s3 + $0x70] sm:$0xff]  ;;  %v62_v34 = vperm.slane %v60_v33, 0  ;;  %v63_v35 = vperm.slane %v60_v33, 1  ;;  %v633_v44 = vld [vmem:[%s3442_s5 + $0x6c8] sm:$0xff] }
  0x41   :  { %337 = vmatpush.msrb.mxu2 %v136_v5  ;;  %357 = vmatpush.msrb.mxu3 %v200_v6  ;;  %v129_v15 = vld [vmem:[%s3440_s3 + $0x98] sm:$0xff]  ;;  %v188_v18 = vld [vmem:[%s3440_s3 + $0x270] sm:$0xff]  ;;  %v521_v45 = vld [vmem:[%s3442_s5 + $0x348] sm:$0xff] }
  0x42   :  { %368 = vmatpush.msra.mxu0 %v173_v49  ;;  %388 = vmatpush.msra.mxu1 %v237_v50  ;;  %v193_v16 = vld [vmem:[%s3440_s3 + $0x298] sm:$0xff]  ;;  %v120_v21 = vld [vmem:[%s3440_s3 + $0x50] sm:$0xff]  ;;  %v857_v46 = vld [vmem:[%s3442_s5 + $0xdc8] sm:$0xff] }
  0x43   :  { %338 = vmatpush.msrb.mxu2 %v132_v9  ;;  %358 = vmatpush.msrb.mxu3 %v196_v10  ;;  %v125_v19 = vld [vmem:[%s3440_s3 + $0x78] sm:$0xff]  ;;  %v184_v22 = vld [vmem:[%s3440_s3 + $0x250] sm:$0xff]  ;;  %v745_v47 = vld [vmem:[%s3442_s5 + $0xa48] sm:$0xff] }
  0x44   :  { %369 = vmatpush.msra.mxu0 %v169_v51  ;;  %389 = vmatpush.msra.mxu1 %v233_v52  ;;  %v189_v20 = vld [vmem:[%s3440_s3 + $0x278] sm:$0xff]  ;;  %v116_v25 = vld [vmem:[%s3440_s3 + $0x30] sm:$0xff]  ;;  %v472_v9 = vld [vmem:[%s3442_s5 + $0x1c0] sm:$0xff] }
  0x45   :  { %339 = vmatpush.msrb.mxu2 %v128_v13  ;;  %359 = vmatpush.msrb.mxu3 %v192_v14  ;;  %v121_v23 = vld [vmem:[%s3440_s3 + $0x58] sm:$0xff]  ;;  %v180_v26 = vld [vmem:[%s3440_s3 + $0x230] sm:$0xff]  ;;  %v808_v10 = vld [vmem:[%s3442_s5 + $0xc40] sm:$0xff] }
  0x46   :  { %370 = vmatpush.msra.mxu0 %v165_v53  ;;  %390 = vmatpush.msra.mxu1 %v229_v54  ;;  %v185_v24 = vld [vmem:[%s3440_s3 + $0x258] sm:$0xff]  ;;  %v112_v29 = vld [vmem:[%s3440_s3 + $0x10] sm:$0xff]  ;;  %v465_v13 = vld [vmem:[%s3442_s5 + $0x188] sm:$0xff] }
  0x47   :  { %340 = vmatpush.msrb.mxu2 %v124_v17  ;;  %360 = vmatpush.msrb.mxu3 %v188_v18  ;;  %v117_v27 = vld [vmem:[%s3440_s3 + $0x38] sm:$0xff]  ;;  %v176_v30 = vld [vmem:[%s3440_s3 + $0x210] sm:$0xff]  ;;  %v801_v14 = vld [vmem:[%s3442_s5 + $0xc08] sm:$0xff] }
  0x48   :  { %371 = vmatpush.msra.mxu0 %v161_v55  ;;  %391 = vmatpush.msra.mxu1 %v225_v56  ;;  %v181_v28 = vld [vmem:[%s3440_s3 + $0x238] sm:$0xff]  ;;  %v626_v48 = vld [vmem:[%s3442_s5 + $0x690] sm:$0xff]  ;;  %v612_v56 = vld [vmem:[%s3442_s5 + $0x620] sm:$0xff] }
  0x49   :  { %341 = vmatpush.msrb.mxu2 %v120_v21  ;;  %361 = vmatpush.msrb.mxu3 %v184_v22  ;;  %v113_v31 = vld [vmem:[%s3440_s3 + $0x18] sm:$0xff]  ;;  %v514_v49 = vld [vmem:[%s3442_s5 + $0x310] sm:$0xff] }
  0x4a   :  { %372 = vmatpush.msra.mxu0 %v157_v57  ;;  %392 = vmatpush.msra.mxu1 %v221_v58  ;;  %v177_v32 = vld [vmem:[%s3440_s3 + $0x218] sm:$0xff]  ;;  %v850_v50 = vld [vmem:[%s3442_s5 + $0xd90] sm:$0xff]  ;;  %v500_v57 = vld [vmem:[%s3442_s5 + $0x2a0] sm:$0xff] }
  0x4b   :  { %342 = vmatpush.msrb.mxu2 %v116_v25  ;;  %362 = vmatpush.msrb.mxu3 %v180_v26  ;;  %v738_v51 = vld [vmem:[%s3442_s5 + $0xa10] sm:$0xff]  ;;  %v619_v52 = vld [vmem:[%s3442_s5 + $0x658] sm:$0xff]  ;;  %v836_v58 = vld [vmem:[%s3442_s5 + $0xd20] sm:$0xff] }
  0x4c   :  { %373 = vmatpush.msra.mxu0 %v153_v59  ;;  %393 = vmatpush.msra.mxu1 %v217_v60  ;;  %v507_v53 = vld [vmem:[%s3442_s5 + $0x2d8] sm:$0xff]  ;;  %v724_v59 = vld [vmem:[%s3442_s5 + $0x9a0] sm:$0xff]  ;;  %v605_v60 = vld [vmem:[%s3442_s5 + $0x5e8] sm:$0xff] }
  0x4d   :  { %343 = vmatpush.msrb.mxu2 %v112_v29  ;;  %363 = vmatpush.msrb.mxu3 %v176_v30  ;;  %v843_v54 = vld [vmem:[%s3442_s5 + $0xd58] sm:$0xff]  ;;  %v486_v1 = vld [vmem:[%s3442_s5 + $0x230] sm:$0xff]  ;;  %v444_v25 = vld [vmem:[%s3442_s5 + $0xe0] sm:$0xff] }
  0x4e   :  { %374 = vmatpush.msra.mxu0 %v149_v61  ;;  %394 = vmatpush.msra.mxu1 %v213_v62  ;;  %v731_v55 = vld [vmem:[%s3442_s5 + $0x9d8] sm:$0xff]  ;;  %v493_v61 = vld [vmem:[%s3442_s5 + $0x268] sm:$0xff]  ;;  %v822_v2 = vld [vmem:[%s3442_s5 + $0xcb0] sm:$0xff] }
  0x4f   :  { %v829_v62 = vld [vmem:[%s3442_s5 + $0xce8] sm:$0xff]  ;;  %v479_v5 = vld [vmem:[%s3442_s5 + $0x1f8] sm:$0xff]  ;;  %v458_v17 = vld [vmem:[%s3442_s5 + $0x150] sm:$0xff] }
  0x50   :  { %375 = vmatpush.msra.mxu0 %v145_v63  ;;  %395 = vmatpush.msra.mxu1 %v209_v0  ;;  %v717_v63 = vld [vmem:[%s3442_s5 + $0x968] sm:$0xff]  ;;  %v598_v0 = vld [vmem:[%s3442_s5 + $0x5b0] sm:$0xff]  ;;  %v815_v6 = vld [vmem:[%s3442_s5 + $0xc78] sm:$0xff] }
  0x51   :  { %v794_v18 = vld [vmem:[%s3442_s5 + $0xbd0] sm:$0xff]  ;;  %v451_v21 = vld [vmem:[%s3442_s5 + $0x118] sm:$0xff]  ;;  %v780_v26 = vld [vmem:[%s3442_s5 + $0xb60] sm:$0xff] }
  0x52   :  { %376 = vmatpush.msra.mxu0 %v141_v3  ;;  %396 = vmatpush.msra.mxu1 %v205_v4  ;;  %v710_v3 = vld [vmem:[%s3442_s5 + $0x930] sm:$0xff]  ;;  %v591_v4 = vld [vmem:[%s3442_s5 + $0x578] sm:$0xff]  ;;  %v437_v29 = vld [vmem:[%s3442_s5 + $0xa8] sm:$0xff] }
  0x53   :  { %v787_v22 = vld [vmem:[%s3442_s5 + $0xb98] sm:$0xff]  ;;  %v773_v30 = vld [vmem:[%s3442_s5 + $0xb28] sm:$0xff]  ;;  %v430_v33 = vld [vmem:[%s3442_s5 + $0x70] sm:$0xff] }
  0x54   :  { %377 = vmatpush.msra.mxu0 %v137_v7  ;;  %397 = vmatpush.msra.mxu1 %v201_v8  ;;  %v703_v7 = vld [vmem:[%s3442_s5 + $0x8f8] sm:$0xff]  ;;  %v584_v8 = vld [vmem:[%s3442_s5 + $0x540] sm:$0xff] }
  0x56   :  { %378 = vmatpush.msra.mxu0 %v133_v11  ;;  %398 = vmatpush.msra.mxu1 %v197_v12  ;;  %v696_v11 = vld [vmem:[%s3442_s5 + $0x8c0] sm:$0xff]  ;;  %v577_v12 = vld [vmem:[%s3442_s5 + $0x508] sm:$0xff] }
  0x58   :  { %379 = vmatpush.msra.mxu0 %v129_v15  ;;  %399 = vmatpush.msra.mxu1 %v193_v16  ;;  %v689_v15 = vld [vmem:[%s3442_s5 + $0x888] sm:$0xff]  ;;  %v570_v16 = vld [vmem:[%s3442_s5 + $0x4d0] sm:$0xff] }
  0x5a   :  { %380 = vmatpush.msra.mxu0 %v125_v19  ;;  %400 = vmatpush.msra.mxu1 %v189_v20  ;;  %v682_v19 = vld [vmem:[%s3442_s5 + $0x850] sm:$0xff]  ;;  %v563_v20 = vld [vmem:[%s3442_s5 + $0x498] sm:$0xff] }
  0x5c   :  { %381 = vmatpush.msra.mxu0 %v121_v23  ;;  %401 = vmatpush.msra.mxu1 %v185_v24  ;;  %v675_v23 = vld [vmem:[%s3442_s5 + $0x818] sm:$0xff]  ;;  %v556_v24 = vld [vmem:[%s3442_s5 + $0x460] sm:$0xff] }
  0x5e   :  { %382 = vmatpush.msra.mxu0 %v117_v27  ;;  %402 = vmatpush.msra.mxu1 %v181_v28  ;;  %v668_v27 = vld [vmem:[%s3442_s5 + $0x7e0] sm:$0xff]  ;;  %v549_v28 = vld [vmem:[%s3442_s5 + $0x428] sm:$0xff] }
  0x60   :  { %383 = vmatpush.msra.mxu0 %v113_v31  ;;  %403 = vmatpush.msra.mxu1 %v177_v32  ;;  %v661_v31 = vld [vmem:[%s3442_s5 + $0x7a8] sm:$0xff]  ;;  %v542_v32 = vld [vmem:[%s3442_s5 + $0x3f0] sm:$0xff] }
  0x9e   :  { %v83_v36 = vpop.f32.mrf.mxu0  ;;  %v103_v37 = vpop.f32.mrf.mxu1 }
  0x9f   :  { %v84_v38 = vadd.f32 %v83_v36, %v62_v34  ;;  %v104_v39 = vadd.f32 %v103_v37, %v63_v35  ;;  %v766_v34 = vld [vmem:[%s3442_s5 + $0xaf0] sm:$0xff]  ;;  %v535_v36 = vld [vmem:[%s3442_s5 + $0x3b8] sm:$0xff] }
  0xa0   :  { %v654_v35 = vld [vmem:[%s3442_s5 + $0x770] sm:$0xff]  ;;  %v423_v37 = vld [vmem:[%s3442_s5 + $0x38] sm:$0xff] }
  0xa1   :  { %v106_v40 = vmul.f32 0.2, %v84_v38  ;;  %v107_v41 = vmul.f32 0.2, %v104_v39 }
  0xa3   :  { %v108_v42 = vmax.f32 %v84_v38, %v106_v40  ;;  %v109_v43 = vmax.f32 %v104_v39, %v107_v41  ;;  %v759_v38 = vld [vmem:[%s3442_s5 + $0xab8] sm:$0xff]  ;;  %v528_v40 = vld [vmem:[%s3442_s5 + $0x380] sm:$0xff] }
  0xa4   :  { %v647_v39 = vld [vmem:[%s3442_s5 + $0x738] sm:$0xff]  ;;  %v416_v41 = vld [vmem:[%s3442_s5] sm:$0xff] }
  0xa5   :  { %264 = vmatmul.f32.vlgmr.msra.gmra.mxu2 %v108_v42  ;;  %284 = vmatmul.f32.vlgmr.msra.gmra.mxu3 %v109_v43 }
  0xa6   :  { %304 = vmatmul.f32.vlgmr.msrb.gmra.mxu0 %v108_v42  ;;  %324 = vmatmul.f32.vlgmr.msrb.gmra.mxu1 %v109_v43 }
  0xa7   :  { %900 = vmatpush.msra.mxu3 %v633_v44  ;;  %880 = vmatpush.msra.mxu2 %v521_v45  ;;  %v752_v44 = vld [vmem:[%s3442_s5 + $0xa80] sm:$0xff] }
  0xa8   :  { %940 = vmatpush.msrb.mxu1 %v857_v46  ;;  %920 = vmatpush.msrb.mxu0 %v745_v47  ;;  %v640_v45 = vld [vmem:[%s3442_s5 + $0x700] sm:$0xff]  ;;  %v627_v46 = vld [vmem:[%s3442_s5 + $0x698] sm:$0xff] }
  0xa9   :  { %901 = vmatpush.msra.mxu3 %v626_v48  ;;  %881 = vmatpush.msra.mxu2 %v514_v49  ;;  %v515_v47 = vld [vmem:[%s3442_s5 + $0x318] sm:$0xff]  ;;  %v858_v48 = vld [vmem:[%s3442_s5 + $0xdd0] sm:$0xff] }
  0xaa   :  { %941 = vmatpush.msrb.mxu1 %v850_v50  ;;  %921 = vmatpush.msrb.mxu0 %v738_v51  ;;  %v746_v49 = vld [vmem:[%s3442_s5 + $0xa50] sm:$0xff]  ;;  %v620_v50 = vld [vmem:[%s3442_s5 + $0x660] sm:$0xff] }
  0xab   :  { %902 = vmatpush.msra.mxu3 %v619_v52  ;;  %882 = vmatpush.msra.mxu2 %v507_v53  ;;  %v508_v51 = vld [vmem:[%s3442_s5 + $0x2e0] sm:$0xff]  ;;  %v851_v52 = vld [vmem:[%s3442_s5 + $0xd98] sm:$0xff] }
  0xac   :  { %942 = vmatpush.msrb.mxu1 %v843_v54  ;;  %922 = vmatpush.msrb.mxu0 %v731_v55  ;;  %v739_v53 = vld [vmem:[%s3442_s5 + $0xa18] sm:$0xff]  ;;  %v613_v54 = vld [vmem:[%s3442_s5 + $0x628] sm:$0xff] }
  0xad   :  { %344 = vmatmul.f32.vlgmr.msrb.gmra.mxu2 %v108_v42  ;;  %364 = vmatmul.f32.vlgmr.msrb.gmra.mxu3 %v109_v43  ;;  %v501_v55 = vld [vmem:[%s3442_s5 + $0x2a8] sm:$0xff] }
  0xae   :  { %384 = vmatmul.f32.vlgmr.msra.gmra.mxu0 %v108_v42  ;;  %404 = vmatmul.f32.vlgmr.msra.gmra.mxu1 %v109_v43  ;;  %v634_v42 = vld [vmem:[%s3442_s5 + $0x6d0] sm:$0xff] }
  0xaf   :  { %903 = vmatpush.msra.mxu3 %v612_v56  ;;  %883 = vmatpush.msra.mxu2 %v500_v57  ;;  %v522_v43 = vld [vmem:[%s3442_s5 + $0x350] sm:$0xff]  ;;  %v844_v56 = vld [vmem:[%s3442_s5 + $0xd60] sm:$0xff] }
  0xb0   :  { %943 = vmatpush.msrb.mxu1 %v836_v58  ;;  %923 = vmatpush.msrb.mxu0 %v724_v59  ;;  %v732_v57 = vld [vmem:[%s3442_s5 + $0x9e0] sm:$0xff]  ;;  %v606_v58 = vld [vmem:[%s3442_s5 + $0x5f0] sm:$0xff] }
  0xb1   :  { %904 = vmatpush.msra.mxu3 %v605_v60  ;;  %884 = vmatpush.msra.mxu2 %v493_v61  ;;  %v494_v59 = vld [vmem:[%s3442_s5 + $0x270] sm:$0xff]  ;;  %v837_v60 = vld [vmem:[%s3442_s5 + $0xd28] sm:$0xff] }
  0xb2   :  { %944 = vmatpush.msrb.mxu1 %v829_v62  ;;  %924 = vmatpush.msrb.mxu0 %v717_v63  ;;  %v725_v61 = vld [vmem:[%s3442_s5 + $0x9a8] sm:$0xff]  ;;  %v599_v62 = vld [vmem:[%s3442_s5 + $0x5b8] sm:$0xff] }
  0xb3   :  { %905 = vmatpush.msra.mxu3 %v598_v0  ;;  %885 = vmatpush.msra.mxu2 %v486_v1  ;;  %v487_v63 = vld [vmem:[%s3442_s5 + $0x238] sm:$0xff]  ;;  %v830_v0 = vld [vmem:[%s3442_s5 + $0xcf0] sm:$0xff]  ;;  %v592_v1 = vld [vmem:[%s3442_s5 + $0x580] sm:$0xff] }
  0xb4   :  { %945 = vmatpush.msrb.mxu1 %v822_v2  ;;  %925 = vmatpush.msrb.mxu0 %v710_v3  ;;  %v480_v2 = vld [vmem:[%s3442_s5 + $0x200] sm:$0xff]  ;;  %v823_v3 = vld [vmem:[%s3442_s5 + $0xcb8] sm:$0xff] }
  0xb5   :  { %906 = vmatpush.msra.mxu3 %v591_v4  ;;  %886 = vmatpush.msra.mxu2 %v479_v5  ;;  %v585_v4 = vld [vmem:[%s3442_s5 + $0x548] sm:$0xff] }
  0xb6   :  { %946 = vmatpush.msrb.mxu1 %v815_v6  ;;  %926 = vmatpush.msrb.mxu0 %v703_v7  ;;  %v473_v5 = vld [vmem:[%s3442_s5 + $0x1c8] sm:$0xff]  ;;  %v816_v6 = vld [vmem:[%s3442_s5 + $0xc80] sm:$0xff]  ;;  %v578_v7 = vld [vmem:[%s3442_s5 + $0x510] sm:$0xff] }
  0xb7   :  { %907 = vmatpush.msra.mxu3 %v584_v8  ;;  %887 = vmatpush.msra.mxu2 %v472_v9  ;;  %v571_v8 = vld [vmem:[%s3442_s5 + $0x4d8] sm:$0xff]  ;;  %v564_v9 = vld [vmem:[%s3442_s5 + $0x4a0] sm:$0xff] }
  0xb8   :  { %947 = vmatpush.msrb.mxu1 %v808_v10  ;;  %927 = vmatpush.msrb.mxu0 %v696_v11  ;;  %v466_v10 = vld [vmem:[%s3442_s5 + $0x190] sm:$0xff]  ;;  %v557_v11 = vld [vmem:[%s3442_s5 + $0x468] sm:$0xff] }
  0xb9   :  { %908 = vmatpush.msra.mxu3 %v577_v12  ;;  %888 = vmatpush.msra.mxu2 %v465_v13  ;;  %v718_v12 = vld [vmem:[%s3442_s5 + $0x970] sm:$0xff]  ;;  %v809_v13 = vld [vmem:[%s3442_s5 + $0xc48] sm:$0xff] }
  0xba   :  { %948 = vmatpush.msrb.mxu1 %v801_v14  ;;  %928 = vmatpush.msrb.mxu0 %v689_v15  ;;  %v459_v14 = vld [vmem:[%s3442_s5 + $0x158] sm:$0xff]  ;;  %v550_v15 = vld [vmem:[%s3442_s5 + $0x430] sm:$0xff] }
  0xbb   :  { %909 = vmatpush.msra.mxu3 %v570_v16  ;;  %889 = vmatpush.msra.mxu2 %v458_v17  ;;  %v711_v16 = vld [vmem:[%s3442_s5 + $0x938] sm:$0xff]  ;;  %v802_v17 = vld [vmem:[%s3442_s5 + $0xc10] sm:$0xff] }
  0xbc   :  { %949 = vmatpush.msrb.mxu1 %v794_v18  ;;  %929 = vmatpush.msrb.mxu0 %v682_v19  ;;  %v452_v18 = vld [vmem:[%s3442_s5 + $0x120] sm:$0xff]  ;;  %v543_v19 = vld [vmem:[%s3442_s5 + $0x3f8] sm:$0xff] }
  0xbd   :  { %910 = vmatpush.msra.mxu3 %v563_v20  ;;  %890 = vmatpush.msra.mxu2 %v451_v21  ;;  %v704_v20 = vld [vmem:[%s3442_s5 + $0x900] sm:$0xff]  ;;  %v795_v21 = vld [vmem:[%s3442_s5 + $0xbd8] sm:$0xff] }
  0xbe   :  { %950 = vmatpush.msrb.mxu1 %v787_v22  ;;  %930 = vmatpush.msrb.mxu0 %v675_v23  ;;  %v445_v22 = vld [vmem:[%s3442_s5 + $0xe8] sm:$0xff]  ;;  %v536_v23 = vld [vmem:[%s3442_s5 + $0x3c0] sm:$0xff] }
  0xbf   :  { %911 = vmatpush.msra.mxu3 %v556_v24  ;;  %891 = vmatpush.msra.mxu2 %v444_v25  ;;  %v697_v24 = vld [vmem:[%s3442_s5 + $0x8c8] sm:$0xff]  ;;  %v788_v25 = vld [vmem:[%s3442_s5 + $0xba0] sm:$0xff] }
  0xc0   :  { %951 = vmatpush.msrb.mxu1 %v780_v26  ;;  %931 = vmatpush.msrb.mxu0 %v668_v27  ;;  %v438_v26 = vld [vmem:[%s3442_s5 + $0xb0] sm:$0xff]  ;;  %v529_v27 = vld [vmem:[%s3442_s5 + $0x388] sm:$0xff] }
  0xc1   :  { %912 = vmatpush.msra.mxu3 %v549_v28  ;;  %892 = vmatpush.msra.mxu2 %v437_v29  ;;  %v690_v28 = vld [vmem:[%s3442_s5 + $0x890] sm:$0xff]  ;;  %v781_v29 = vld [vmem:[%s3442_s5 + $0xb68] sm:$0xff] }
  0xc2   :  { %952 = vmatpush.msrb.mxu1 %v773_v30  ;;  %932 = vmatpush.msrb.mxu0 %v661_v31  ;;  %v431_v30 = vld [vmem:[%s3442_s5 + $0x78] sm:$0xff] }
  0xc3   :  { %913 = vmatpush.msra.mxu3 %v542_v32  ;;  %893 = vmatpush.msra.mxu2 %v430_v33  ;;  %v683_v31 = vld [vmem:[%s3442_s5 + $0x858] sm:$0xff]  ;;  %v774_v32 = vld [vmem:[%s3442_s5 + $0xb30] sm:$0xff]  ;;  %v424_v33 = vld [vmem:[%s3442_s5 + $0x40] sm:$0xff] }
  0xc4   :  { %953 = vmatpush.msrb.mxu1 %v766_v34  ;;  %933 = vmatpush.msrb.mxu0 %v654_v35  ;;  %v676_v34 = vld [vmem:[%s3442_s5 + $0x820] sm:$0xff]  ;;  %v767_v35 = vld [vmem:[%s3442_s5 + $0xaf8] sm:$0xff] }
  0xc5   :  { %914 = vmatpush.msra.mxu3 %v535_v36  ;;  %894 = vmatpush.msra.mxu2 %v423_v37  ;;  %v417_v36 = vld [vmem:[%s3442_s5 + $0x8] sm:$0xff] }
  0xc6   :  { %954 = vmatpush.msrb.mxu1 %v759_v38  ;;  %934 = vmatpush.msrb.mxu0 %v647_v39  ;;  %v669_v37 = vld [vmem:[%s3442_s5 + $0x7e8] sm:$0xff]  ;;  %v760_v38 = vld [vmem:[%s3442_s5 + $0xac0] sm:$0xff]  ;;  %v662_v39 = vld [vmem:[%s3442_s5 + $0x7b0] sm:$0xff] }
  0xc7   :  { %915 = vmatpush.msra.mxu3 %v528_v40  ;;  %895 = vmatpush.msra.mxu2 %v416_v41  ;;  %v753_v40 = vld [vmem:[%s3442_s5 + $0xa88] sm:$0xff]  ;;  %v655_v41 = vld [vmem:[%s3442_s5 + $0x778] sm:$0xff] }
  0xc8   :  { %955 = vmatpush.msrb.mxu1 %v752_v44  ;;  %935 = vmatpush.msrb.mxu0 %v640_v45  ;;  %v238_v44 = vld [vmem:[%s3441_s4] sm:$0xf] }
  0xc9   :  { %980 = vmatpush.msrb.mxu3 %v634_v42  ;;  %960 = vmatpush.msrb.mxu2 %v522_v43  ;;  %v648_v42 = vld [vmem:[%s3442_s5 + $0x740] sm:$0xff]  ;;  %v641_v43 = vld [vmem:[%s3442_s5 + $0x708] sm:$0xff]  ;;  %v241_v45 = vperm.slane %v238_v44, 1 }
  0xca   :  { %1020 = vmatpush.msra.mxu1 %v858_v48  ;;  %1000 = vmatpush.msra.mxu0 %v746_v49  ;;  %v240_v49 = vperm.slane %v238_v44, 0 }
  0xcb   :  { %981 = vmatpush.msrb.mxu3 %v627_v46  ;;  %961 = vmatpush.msrb.mxu2 %v515_v47 }
  0xcc   :  { %1021 = vmatpush.msra.mxu1 %v851_v52  ;;  %1001 = vmatpush.msra.mxu0 %v739_v53 }
  0xcd   :  { %982 = vmatpush.msrb.mxu3 %v620_v50  ;;  %962 = vmatpush.msrb.mxu2 %v508_v51 }
  0xce   :  { %1022 = vmatpush.msra.mxu1 %v844_v56  ;;  %1002 = vmatpush.msra.mxu0 %v732_v57  ;;  %v635_v57 = vld [vmem:[%s3442_s5 + $0x6d8] sm:$0xff] }
  0xcf   :  { %983 = vmatpush.msrb.mxu3 %v613_v54  ;;  %963 = vmatpush.msrb.mxu2 %v501_v55  ;;  %v243_v54 = vperm.slane %v238_v44, 3 }
  0xd0   :  { %1023 = vmatpush.msra.mxu1 %v837_v60  ;;  %1003 = vmatpush.msra.mxu0 %v725_v61  ;;  %v628_v61 = vld [vmem:[%s3442_s5 + $0x6a0] sm:$0xff] }
  0xd1   :  { %984 = vmatpush.msrb.mxu3 %v606_v58  ;;  %964 = vmatpush.msrb.mxu2 %v494_v59 }
  0xd2   :  { %1024 = vmatpush.msra.mxu1 %v830_v0  ;;  %1004 = vmatpush.msra.mxu0 %v718_v12  ;;  %v242_v0 = vperm.slane %v238_v44, 2  ;;  %v607_v12 = vld [vmem:[%s3442_s5 + $0x5f8] sm:$0xff] }
  0xd3   :  { %985 = vmatpush.msrb.mxu3 %v599_v62  ;;  %965 = vmatpush.msrb.mxu2 %v487_v63  ;;  %v551_v44 = vld [vmem:[%s3442_s5 + $0x438] sm:$0xff] }
  0xd4   :  { %1025 = vmatpush.msra.mxu1 %v823_v3  ;;  %1005 = vmatpush.msra.mxu0 %v711_v16  ;;  %v600_v16 = vld [vmem:[%s3442_s5 + $0x5c0] sm:$0xff] }
  0xd5   :  { %986 = vmatpush.msrb.mxu3 %v592_v1  ;;  %966 = vmatpush.msrb.mxu2 %v480_v2  ;;  %v621_v2 = vld [vmem:[%s3442_s5 + $0x668] sm:$0xff] }
  0xd6   :  { %1026 = vmatpush.msra.mxu1 %v816_v6  ;;  %1006 = vmatpush.msra.mxu0 %v704_v20  ;;  %v593_v20 = vld [vmem:[%s3442_s5 + $0x588] sm:$0xff] }
  0xd7   :  { %987 = vmatpush.msrb.mxu3 %v585_v4  ;;  %967 = vmatpush.msrb.mxu2 %v473_v5  ;;  %v523_v4 = vld [vmem:[%s3442_s5 + $0x358] sm:$0xff] }
  0xd8   :  { %1027 = vmatpush.msra.mxu1 %v809_v13  ;;  %1007 = vmatpush.msra.mxu0 %v697_v24  ;;  %v495_v24 = vld [vmem:[%s3442_s5 + $0x278] sm:$0xff] }
  0xd9   :  { %988 = vmatpush.msrb.mxu3 %v578_v7  ;;  %968 = vmatpush.msrb.mxu2 %v466_v10  ;;  %v614_v7 = vld [vmem:[%s3442_s5 + $0x630] sm:$0xff] }
  0xda   :  { %1028 = vmatpush.msra.mxu1 %v802_v17  ;;  %1008 = vmatpush.msra.mxu0 %v690_v28  ;;  %v488_v28 = vld [vmem:[%s3442_s5 + $0x240] sm:$0xff] }
  0xdb   :  { %989 = vmatpush.msrb.mxu3 %v571_v8  ;;  %969 = vmatpush.msrb.mxu2 %v459_v14  ;;  %v859_v14 = vld [vmem:[%s3442_s5 + $0xdd8] sm:$0xff] }
  0xdc   :  { %1029 = vmatpush.msra.mxu1 %v795_v21  ;;  %1009 = vmatpush.msra.mxu0 %v683_v31  ;;  %v481_v31 = vld [vmem:[%s3442_s5 + $0x208] sm:$0xff] }
  0xdd   :  { %990 = vmatpush.msrb.mxu3 %v564_v9  ;;  %970 = vmatpush.msrb.mxu2 %v452_v18  ;;  %v852_v18 = vld [vmem:[%s3442_s5 + $0xda0] sm:$0xff] }
  0xde   :  { %1030 = vmatpush.msra.mxu1 %v788_v25  ;;  %1010 = vmatpush.msra.mxu0 %v676_v34  ;;  %v747_v25 = vld [vmem:[%s3442_s5 + $0xa58] sm:$0xff]  ;;  %v824_v34 = vld [vmem:[%s3442_s5 + $0xcc0] sm:$0xff] }
  0xdf   :  { %991 = vmatpush.msrb.mxu3 %v557_v11  ;;  %971 = vmatpush.msrb.mxu2 %v445_v22  ;;  %v516_v11 = vld [vmem:[%s3442_s5 + $0x320] sm:$0xff]  ;;  %v845_v22 = vld [vmem:[%s3442_s5 + $0xd68] sm:$0xff] }
  0xe0   :  { %1031 = vmatpush.msra.mxu1 %v781_v29  ;;  %1011 = vmatpush.msra.mxu0 %v669_v37  ;;  %v740_v29 = vld [vmem:[%s3442_s5 + $0xa20] sm:$0xff]  ;;  %v726_v37 = vld [vmem:[%s3442_s5 + $0x9b0] sm:$0xff] }
  0xe1   :  { %992 = vmatpush.msrb.mxu3 %v550_v15  ;;  %972 = vmatpush.msrb.mxu2 %v438_v26  ;;  %v509_v15 = vld [vmem:[%s3442_s5 + $0x2e8] sm:$0xff]  ;;  %v838_v26 = vld [vmem:[%s3442_s5 + $0xd30] sm:$0xff] }
  0xe2   :  { %1032 = vmatpush.msra.mxu1 %v774_v32  ;;  %1012 = vmatpush.msra.mxu0 %v662_v39  ;;  %v572_v32 = vld [vmem:[%s3442_s5 + $0x4e0] sm:$0xff]  ;;  %v467_v39 = vld [vmem:[%s3442_s5 + $0x198] sm:$0xff] }
  0xe3   :  { %993 = vmatpush.msrb.mxu3 %v543_v19  ;;  %973 = vmatpush.msrb.mxu2 %v431_v30  ;;  %v502_v19 = vld [vmem:[%s3442_s5 + $0x2b0] sm:$0xff]  ;;  %v831_v30 = vld [vmem:[%s3442_s5 + $0xcf8] sm:$0xff] }
  0xe4   :  { %1033 = vmatpush.msra.mxu1 %v767_v35  ;;  %1013 = vmatpush.msra.mxu0 %v655_v41  ;;  %v474_v35 = vld [vmem:[%s3442_s5 + $0x1d0] sm:$0xff]  ;;  %v719_v41 = vld [vmem:[%s3442_s5 + $0x978] sm:$0xff] }
  0xe5   :  { %994 = vmatpush.msrb.mxu3 %v536_v23  ;;  %974 = vmatpush.msrb.mxu2 %v424_v33  ;;  %v586_v23 = vld [vmem:[%s3442_s5 + $0x550] sm:$0xff]  ;;  %v733_v33 = vld [vmem:[%s3442_s5 + $0x9e8] sm:$0xff] }
  0xe6   :  { %1034 = vmatpush.msra.mxu1 %v760_v38  ;;  %1014 = vmatpush.msra.mxu0 %v648_v42  ;;  %v817_v38 = vld [vmem:[%s3442_s5 + $0xc88] sm:$0xff]  ;;  %v810_v42 = vld [vmem:[%s3442_s5 + $0xc50] sm:$0xff] }
  0xe7   :  { %995 = vmatpush.msrb.mxu3 %v529_v27  ;;  %975 = vmatpush.msrb.mxu2 %v417_v36  ;;  %v579_v27 = vld [vmem:[%s3442_s5 + $0x518] sm:$0xff]  ;;  %v565_v36 = vld [vmem:[%s3442_s5 + $0x4a8] sm:$0xff] }
  0xe8   :  { %1035 = vmatpush.msra.mxu1 %v753_v40  ;;  %1015 = vmatpush.msra.mxu0 %v641_v43  ;;  %v558_v40 = vld [vmem:[%s3442_s5 + $0x470] sm:$0xff]  ;;  %v460_v43 = vld [vmem:[%s3442_s5 + $0x160] sm:$0xff] }
 0x123   :  { %v305_v46 = vpop.f32.mrf.mxu0  ;;  %v325_v47 = vpop.f32.mrf.mxu1 }
 0x124   :  { %v306_v48 = vadd.f32 %v305_v46, %v241_v45  ;;  %v712_v45 = vld [vmem:[%s3442_s5 + $0x940] sm:$0xff]  ;;  %v803_v46 = vld [vmem:[%s3442_s5 + $0xc18] sm:$0xff] }
 0x126   :  { %v326_v50 = vadd.f32 %v325_v47, %v306_v48  ;;  %v453_v47 = vld [vmem:[%s3442_s5 + $0x128] sm:$0xff]  ;;  %v544_v48 = vld [vmem:[%s3442_s5 + $0x400] sm:$0xff] }
 0x128   :  { %v409_v51 = vmul.f32 0.2, %v326_v50  ;;  %v265_v52 = vpop.f32.mrf.mxu2  ;;  %v285_v53 = vpop.f32.mrf.mxu3 }
 0x129   :  { %v266_v55 = vadd.f32 %v265_v52, %v240_v49  ;;  %v705_v49 = vld [vmem:[%s3442_s5 + $0x908] sm:$0xff] }
 0x12a   :  { %v2426_v56 = vmax.f32 %v326_v50, %v409_v51  ;;  %v796_v50 = vld [vmem:[%s3442_s5 + $0xbe0] sm:$0xff]  ;;  %v446_v51 = vld [vmem:[%s3442_s5 + $0xf0] sm:$0xff]  ;;  %v537_v52 = vld [vmem:[%s3442_s5 + $0x3c8] sm:$0xff] }
 0x12b   :  { %v286_v58 = vadd.f32 %v285_v53, %v266_v55  ;;  %v385_v59 = vpop.f32.mrf.mxu0  ;;  %v405_v63 = vpop.f32.mrf.mxu1  ;;  %v698_v53 = vld [vmem:[%s3442_s5 + $0x8d0] sm:$0xff]  ;;  %v439_v55 = vld [vmem:[%s3442_s5 + $0xb8] sm:$0xff] }
 0x12c   :  { %v386_v60 = vadd.f32 %v385_v59, %v243_v54  ;;  %916 = vmatmul.f32.vlgmr.msra.gmra.mxu3 %v2426_v56  ;;  %v789_v54 = vld [vmem:[%s3442_s5 + $0xba8] sm:$0xff]  ;;  %v782_v59 = vld [vmem:[%s3442_s5 + $0xb70] sm:$0xff] }
 0x12d   :  { %v408_v62 = vmul.f32 0.2, %v286_v58  ;;  %1060 = vmatpush.msra.mxu3 %v635_v57  ;;  %v530_v57 = vld [vmem:[%s3442_s5 + $0x390] sm:$0xff] }
 0x12e   :  { %v406_v1 = vadd.f32 %v405_v63, %v386_v60  ;;  %v636_v60 = vld [vmem:[%s3442_s5 + $0x6e0] sm:$0xff]  ;;  %v775_v63 = vld [vmem:[%s3442_s5 + $0xb38] sm:$0xff] }
 0x12f   :  { %v2438_v3 = vmax.f32 %v286_v58, %v408_v62  ;;  %1061 = vmatpush.msra.mxu3 %v628_v61  ;;  %v691_v58 = vld [vmem:[%s3442_s5 + $0x898] sm:$0xff]  ;;  %v432_v61 = vld [vmem:[%s3442_s5 + $0x80] sm:$0xff] }
 0x130   :  { %v411_v5 = vmul.f32 0.2, %v406_v1  ;;  %v345_v6 = vpop.f32.mrf.mxu2  ;;  %v365_v10 = vpop.f32.mrf.mxu3  ;;  %v684_v62 = vld [vmem:[%s3442_s5 + $0x860] sm:$0xff] }
 0x131   :  { %1062 = vmatpush.msra.mxu3 %v621_v2  ;;  %v346_v8 = vadd.f32 %v345_v6, %v242_v0  ;;  %896 = vmatmul.f32.vlgmr.msra.gmra.mxu2 %v2438_v3  ;;  %v629_v0 = vld [vmem:[%s3442_s5 + $0x6a8] sm:$0xff]  ;;  %v418_v6 = vld [vmem:[%s3442_s5 + $0x10] sm:$0xff] }
 0x132   :  { %v2447_v9 = vmax.f32 %v406_v1, %v411_v5  ;;  %1040 = vmatpush.msra.mxu2 %v523_v4  ;;  %v425_v1 = vld [vmem:[%s3442_s5 + $0x48] sm:$0xff]  ;;  %v768_v4 = vld [vmem:[%s3442_s5 + $0xb00] sm:$0xff]  ;;  %v622_v5 = vld [vmem:[%s3442_s5 + $0x670] sm:$0xff] }
 0x133   :  { %v366_v13 = vadd.f32 %v365_v10, %v346_v8  ;;  %1063 = vmatpush.msra.mxu3 %v614_v7  ;;  %v677_v2 = vld [vmem:[%s3442_s5 + $0x828] sm:$0xff]  ;;  %v670_v7 = vld [vmem:[%s3442_s5 + $0x7f0] sm:$0xff]  ;;  %v615_v10 = vld [vmem:[%s3442_s5 + $0x638] sm:$0xff] }
 0x134   :  { %956 = vmatmul.f32.vlgmr.msrb.gmra.mxu1 %v2447_v9  ;;  %996 = vmatmul.f32.vlgmr.msrb.gmra.mxu3 %v2426_v56  ;;  %v761_v8 = vld [vmem:[%s3442_s5 + $0xac8] sm:$0xff] }
 0x135   :  { %v410_v17 = vmul.f32 0.2, %v366_v13  ;;  %1041 = vmatpush.msra.mxu2 %v516_v11  ;;  %1064 = vmatpush.msra.mxu3 %v607_v12  ;;  %v524_v11 = vld [vmem:[%s3442_s5 + $0x360] sm:$0xff]  ;;  %v663_v12 = vld [vmem:[%s3442_s5 + $0x7b8] sm:$0xff] }
 0x136   :  { %1100 = vmatpush.msrb.mxu1 %v859_v14  ;;  %v608_v14 = vld [vmem:[%s3442_s5 + $0x600] sm:$0xff] }
 0x137   :  { %v2475_v21 = vmax.f32 %v366_v13, %v410_v17  ;;  %1042 = vmatpush.msra.mxu2 %v509_v15  ;;  %1065 = vmatpush.msra.mxu3 %v600_v16  ;;  %v754_v13 = vld [vmem:[%s3442_s5 + $0xa90] sm:$0xff]  ;;  %v517_v15 = vld [vmem:[%s3442_s5 + $0x328] sm:$0xff]  ;;  %v860_v16 = vld [vmem:[%s3442_s5 + $0xde0] sm:$0xff] }
 0x138   :  { %1101 = vmatpush.msrb.mxu1 %v852_v18  ;;  %v656_v17 = vld [vmem:[%s3442_s5 + $0x780] sm:$0xff]  ;;  %v510_v18 = vld [vmem:[%s3442_s5 + $0x2f0] sm:$0xff] }
 0x139   :  { %1043 = vmatpush.msra.mxu2 %v502_v19  ;;  %1066 = vmatpush.msra.mxu3 %v593_v20  ;;  %v601_v19 = vld [vmem:[%s3442_s5 + $0x5c8] sm:$0xff] }
 0x13a   :  { %1102 = vmatpush.msrb.mxu1 %v845_v22  ;;  %936 = vmatmul.f32.vlgmr.msrb.gmra.mxu0 %v2475_v21  ;;  %v853_v20 = vld [vmem:[%s3442_s5 + $0xda8] sm:$0xff] }
 0x13b   :  { %976 = vmatmul.f32.vlgmr.msrb.gmra.mxu2 %v2438_v3  ;;  %1067 = vmatpush.msra.mxu3 %v586_v23  ;;  %v649_v22 = vld [vmem:[%s3442_s5 + $0x748] sm:$0xff]  ;;  %v503_v23 = vld [vmem:[%s3442_s5 + $0x2b8] sm:$0xff] }
 0x13c   :  { %1044 = vmatpush.msra.mxu2 %v495_v24  ;;  %1080 = vmatpush.msrb.mxu0 %v747_v25  ;;  %v594_v24 = vld [vmem:[%s3442_s5 + $0x590] sm:$0xff] }
 0x13d   :  { %1103 = vmatpush.msrb.mxu1 %v838_v26  ;;  %1068 = vmatpush.msra.mxu3 %v579_v27  ;;  %v846_v25 = vld [vmem:[%s3442_s5 + $0xd70] sm:$0xff]  ;;  %v496_v27 = vld [vmem:[%s3442_s5 + $0x280] sm:$0xff] }
 0x13e   :  { %1036 = vmatmul.f32.vlgmr.msra.gmra.mxu1 %v2447_v9  ;;  %1045 = vmatpush.msra.mxu2 %v488_v28  ;;  %v642_v26 = vld [vmem:[%s3442_s5 + $0x710] sm:$0xff]  ;;  %v587_v28 = vld [vmem:[%s3442_s5 + $0x558] sm:$0xff] }
 0x13f   :  { %1081 = vmatpush.msrb.mxu0 %v740_v29  ;;  %1104 = vmatpush.msrb.mxu1 %v831_v30  ;;  %v748_v29 = vld [vmem:[%s3442_s5 + $0xa60] sm:$0xff]  ;;  %v839_v30 = vld [vmem:[%s3442_s5 + $0xd38] sm:$0xff] }
 0x140   :  { %1046 = vmatpush.msra.mxu2 %v481_v31  ;;  %1069 = vmatpush.msra.mxu3 %v572_v32  ;;  %v489_v31 = vld [vmem:[%s3442_s5 + $0x248] sm:$0xff]  ;;  %v580_v32 = vld [vmem:[%s3442_s5 + $0x520] sm:$0xff] }
 0x141   :  { %1082 = vmatpush.msrb.mxu0 %v733_v33  ;;  %1105 = vmatpush.msrb.mxu1 %v824_v34  ;;  %v741_v33 = vld [vmem:[%s3442_s5 + $0xa28] sm:$0xff]  ;;  %v832_v34 = vld [vmem:[%s3442_s5 + $0xd00] sm:$0xff] }
 0x142   :  { %1047 = vmatpush.msra.mxu2 %v474_v35  ;;  %1070 = vmatpush.msra.mxu3 %v565_v36  ;;  %v482_v35 = vld [vmem:[%s3442_s5 + $0x210] sm:$0xff]  ;;  %v573_v36 = vld [vmem:[%s3442_s5 + $0x4e8] sm:$0xff] }
 0x143   :  { %1083 = vmatpush.msrb.mxu0 %v726_v37  ;;  %1106 = vmatpush.msrb.mxu1 %v817_v38  ;;  %v734_v37 = vld [vmem:[%s3442_s5 + $0x9f0] sm:$0xff]  ;;  %v825_v38 = vld [vmem:[%s3442_s5 + $0xcc8] sm:$0xff] }
 0x144   :  { %1016 = vmatmul.f32.vlgmr.msra.gmra.mxu0 %v2475_v21  ;;  %1048 = vmatpush.msra.mxu2 %v467_v39  ;;  %v475_v39 = vld [vmem:[%s3442_s5 + $0x1d8] sm:$0xff] }
 0x145   :  { %1071 = vmatpush.msra.mxu3 %v558_v40  ;;  %1084 = vmatpush.msrb.mxu0 %v719_v41  ;;  %v566_v40 = vld [vmem:[%s3442_s5 + $0x4b0] sm:$0xff]  ;;  %v727_v41 = vld [vmem:[%s3442_s5 + $0x9b8] sm:$0xff] }
 0x146   :  { %1107 = vmatpush.msrb.mxu1 %v810_v42  ;;  %1049 = vmatpush.msra.mxu2 %v460_v43  ;;  %v818_v42 = vld [vmem:[%s3442_s5 + $0xc90] sm:$0xff]  ;;  %v468_v43 = vld [vmem:[%s3442_s5 + $0x1a0] sm:$0xff] }
 0x147   :  { %1072 = vmatpush.msra.mxu3 %v551_v44  ;;  %1085 = vmatpush.msrb.mxu0 %v712_v45  ;;  %v559_v44 = vld [vmem:[%s3442_s5 + $0x478] sm:$0xff]  ;;  %v720_v45 = vld [vmem:[%s3442_s5 + $0x980] sm:$0xff] }
 0x148   :  { %1108 = vmatpush.msrb.mxu1 %v803_v46  ;;  %1050 = vmatpush.msra.mxu2 %v453_v47  ;;  %v811_v46 = vld [vmem:[%s3442_s5 + $0xc58] sm:$0xff]  ;;  %v461_v47 = vld [vmem:[%s3442_s5 + $0x168] sm:$0xff] }
 0x149   :  { %1073 = vmatpush.msra.mxu3 %v544_v48  ;;  %1086 = vmatpush.msrb.mxu0 %v705_v49  ;;  %v552_v48 = vld [vmem:[%s3442_s5 + $0x440] sm:$0xff]  ;;  %v713_v49 = vld [vmem:[%s3442_s5 + $0x948] sm:$0xff] }
 0x14a   :  { %1109 = vmatpush.msrb.mxu1 %v796_v50  ;;  %1051 = vmatpush.msra.mxu2 %v446_v51  ;;  %v804_v50 = vld [vmem:[%s3442_s5 + $0xc20] sm:$0xff]  ;;  %v454_v51 = vld [vmem:[%s3442_s5 + $0x130] sm:$0xff] }
 0x14b   :  { %1074 = vmatpush.msra.mxu3 %v537_v52  ;;  %1087 = vmatpush.msrb.mxu0 %v698_v53  ;;  %v545_v52 = vld [vmem:[%s3442_s5 + $0x408] sm:$0xff]  ;;  %v706_v53 = vld [vmem:[%s3442_s5 + $0x910] sm:$0xff] }
 0x14c   :  { %1110 = vmatpush.msrb.mxu1 %v789_v54  ;;  %1052 = vmatpush.msra.mxu2 %v439_v55  ;;  %v797_v54 = vld [vmem:[%s3442_s5 + $0xbe8] sm:$0xff]  ;;  %v447_v55 = vld [vmem:[%s3442_s5 + $0xf8] sm:$0xff] }
 0x14d   :  { %1075 = vmatpush.msra.mxu3 %v530_v57  ;;  %1088 = vmatpush.msrb.mxu0 %v691_v58  ;;  %v538_v57 = vld [vmem:[%s3442_s5 + $0x3d0] sm:$0xff]  ;;  %v699_v58 = vld [vmem:[%s3442_s5 + $0x8d8] sm:$0xff] }
 0x14e   :  { %1111 = vmatpush.msrb.mxu1 %v782_v59  ;;  %1076 = vmatmul.f32.vlgmr.msra.gmra.mxu3 %v2426_v56  ;;  %v790_v59 = vld [vmem:[%s3442_s5 + $0xbb0] sm:$0xff] }
 0x14f   :  { %1140 = vmatpush.msrb.mxu3 %v636_v60  ;;  %1053 = vmatpush.msra.mxu2 %v432_v61  ;;  %v440_v60 = vld [vmem:[%s3442_s5 + $0xc0] sm:$0xff]  ;;  %v531_v61 = vld [vmem:[%s3442_s5 + $0x398] sm:$0xff] }
 0x150   :  { %1089 = vmatpush.msrb.mxu0 %v684_v62  ;;  %1112 = vmatpush.msrb.mxu1 %v775_v63  ;;  %v692_v62 = vld [vmem:[%s3442_s5 + $0x8a0] sm:$0xff]  ;;  %v783_v63 = vld [vmem:[%s3442_s5 + $0xb78] sm:$0xff] }
 0x151   :  { %1141 = vmatpush.msrb.mxu3 %v629_v0  ;;  %1054 = vmatpush.msra.mxu2 %v425_v1  ;;  %v637_v0 = vld [vmem:[%s3442_s5 + $0x6e8] sm:$0xff] }
 0x152   :  { %1090 = vmatpush.msrb.mxu0 %v677_v2  ;;  %1113 = vmatpush.msrb.mxu1 %v768_v4  ;;  %v433_v1 = vld [vmem:[%s3442_s5 + $0x88] sm:$0xff]  ;;  %v776_v4 = vld [vmem:[%s3442_s5 + $0xb40] sm:$0xff] }
 0x153   :  { %1142 = vmatpush.msrb.mxu3 %v622_v5  ;;  %1055 = vmatpush.msra.mxu2 %v418_v6  ;;  %v685_v2 = vld [vmem:[%s3442_s5 + $0x868] sm:$0xff]  ;;  %v630_v5 = vld [vmem:[%s3442_s5 + $0x6b0] sm:$0xff] }
 0x154   :  { %1091 = vmatpush.msrb.mxu0 %v670_v7  ;;  %1114 = vmatpush.msrb.mxu1 %v761_v8  ;;  %v426_v6 = vld [vmem:[%s3442_s5 + $0x50] sm:$0xff]  ;;  %v769_v8 = vld [vmem:[%s3442_s5 + $0xb08] sm:$0xff] }
 0x155   :  { %1056 = vmatmul.f32.vlgmr.msra.gmra.mxu2 %v2438_v3  ;;  %1143 = vmatpush.msrb.mxu3 %v615_v10  ;;  %v678_v7 = vld [vmem:[%s3442_s5 + $0x830] sm:$0xff]  ;;  %v623_v10 = vld [vmem:[%s3442_s5 + $0x678] sm:$0xff] }
 0x156   :  { %1120 = vmatpush.msrb.mxu2 %v524_v11  ;;  %1092 = vmatpush.msrb.mxu0 %v663_v12  ;;  %v419_v11 = vld [vmem:[%s3442_s5 + $0x18] sm:$0xff] }
 0x157   :  { %1115 = vmatpush.msrb.mxu1 %v754_v13  ;;  %1144 = vmatpush.msrb.mxu3 %v608_v14  ;;  %v671_v12 = vld [vmem:[%s3442_s5 + $0x7f8] sm:$0xff]  ;;  %v762_v13 = vld [vmem:[%s3442_s5 + $0xad0] sm:$0xff]  ;;  %v616_v14 = vld [vmem:[%s3442_s5 + $0x640] sm:$0xff] }
 0x158   :  { %1116 = vmatmul.f32.vlgmr.msrb.gmra.mxu1 %v2447_v9  ;;  %1121 = vmatpush.msrb.mxu2 %v517_v15  ;;  %v525_v15 = vld [vmem:[%s3442_s5 + $0x368] sm:$0xff] }
 0x159   :  { %1180 = vmatpush.msra.mxu1 %v860_v16  ;;  %1093 = vmatpush.msrb.mxu0 %v656_v17  ;;  %v664_v16 = vld [vmem:[%s3442_s5 + $0x7c0] sm:$0xff]  ;;  %v755_v17 = vld [vmem:[%s3442_s5 + $0xa98] sm:$0xff] }
 0x15a   :  { %1122 = vmatpush.msrb.mxu2 %v510_v18  ;;  %1145 = vmatpush.msrb.mxu3 %v601_v19  ;;  %v609_v18 = vld [vmem:[%s3442_s5 + $0x608] sm:$0xff]  ;;  %v518_v19 = vld [vmem:[%s3442_s5 + $0x330] sm:$0xff] }
 0x15b   :  { %1181 = vmatpush.msra.mxu1 %v853_v20  ;;  %1094 = vmatpush.msrb.mxu0 %v649_v22  ;;  %v861_v20 = vld [vmem:[%s3442_s5 + $0xde8] sm:$0xff] }
 0x15c   :  { %1123 = vmatpush.msrb.mxu2 %v503_v23  ;;  %1146 = vmatpush.msrb.mxu3 %v594_v24  ;;  %v657_v22 = vld [vmem:[%s3442_s5 + $0x788] sm:$0xff]  ;;  %v511_v23 = vld [vmem:[%s3442_s5 + $0x2f8] sm:$0xff]  ;;  %v602_v24 = vld [vmem:[%s3442_s5 + $0x5d0] sm:$0xff] }
 0x15d   :  { %1182 = vmatpush.msra.mxu1 %v846_v25  ;;  %1095 = vmatpush.msrb.mxu0 %v642_v26  ;;  %v854_v25 = vld [vmem:[%s3442_s5 + $0xdb0] sm:$0xff] }
 0x15e   :  { %1096 = vmatmul.f32.vlgmr.msrb.gmra.mxu0 %v2475_v21  ;;  %1124 = vmatpush.msrb.mxu2 %v496_v27  ;;  %v650_v26 = vld [vmem:[%s3442_s5 + $0x750] sm:$0xff]  ;;  %v504_v27 = vld [vmem:[%s3442_s5 + $0x2c0] sm:$0xff] }
 0x15f   :  { %1147 = vmatpush.msrb.mxu3 %v587_v28  ;;  %1160 = vmatpush.msra.mxu0 %v748_v29  ;;  %v595_v28 = vld [vmem:[%s3442_s5 + $0x598] sm:$0xff] }
 0x160   :  { %1183 = vmatpush.msra.mxu1 %v839_v30  ;;  %1125 = vmatpush.msrb.mxu2 %v489_v31  ;;  %v847_v29 = vld [vmem:[%s3442_s5 + $0xd78] sm:$0xff]  ;;  %v497_v31 = vld [vmem:[%s3442_s5 + $0x288] sm:$0xff] }
 0x161   :  { %1148 = vmatpush.msrb.mxu3 %v580_v32  ;;  %1161 = vmatpush.msra.mxu0 %v741_v33  ;;  %v643_v30 = vld [vmem:[%s3442_s5 + $0x718] sm:$0xff]  ;;  %v588_v32 = vld [vmem:[%s3442_s5 + $0x560] sm:$0xff]  ;;  %v749_v33 = vld [vmem:[%s3442_s5 + $0xa68] sm:$0xff] }
 0x162   :  { %1184 = vmatpush.msra.mxu1 %v832_v34  ;;  %1126 = vmatpush.msrb.mxu2 %v482_v35  ;;  %v840_v34 = vld [vmem:[%s3442_s5 + $0xd40] sm:$0xff]  ;;  %v490_v35 = vld [vmem:[%s3442_s5 + $0x250] sm:$0xff] }
 0x163   :  { %1149 = vmatpush.msrb.mxu3 %v573_v36  ;;  %1162 = vmatpush.msra.mxu0 %v734_v37  ;;  %v581_v36 = vld [vmem:[%s3442_s5 + $0x528] sm:$0xff]  ;;  %v742_v37 = vld [vmem:[%s3442_s5 + $0xa30] sm:$0xff] }
 0x164   :  { %1185 = vmatpush.msra.mxu1 %v825_v38  ;;  %1127 = vmatpush.msrb.mxu2 %v475_v39  ;;  %v833_v38 = vld [vmem:[%s3442_s5 + $0xd08] sm:$0xff]  ;;  %v483_v39 = vld [vmem:[%s3442_s5 + $0x218] sm:$0xff] }
 0x165   :  { %1150 = vmatpush.msrb.mxu3 %v566_v40  ;;  %1163 = vmatpush.msra.mxu0 %v727_v41  ;;  %v574_v40 = vld [vmem:[%s3442_s5 + $0x4f0] sm:$0xff]  ;;  %v735_v41 = vld [vmem:[%s3442_s5 + $0x9f8] sm:$0xff] }
 0x166   :  { %1186 = vmatpush.msra.mxu1 %v818_v42  ;;  %1128 = vmatpush.msrb.mxu2 %v468_v43  ;;  %v826_v42 = vld [vmem:[%s3442_s5 + $0xcd0] sm:$0xff]  ;;  %v476_v43 = vld [vmem:[%s3442_s5 + $0x1e0] sm:$0xff] }
 0x167   :  { %1151 = vmatpush.msrb.mxu3 %v559_v44  ;;  %1164 = vmatpush.msra.mxu0 %v720_v45  ;;  %v567_v44 = vld [vmem:[%s3442_s5 + $0x4b8] sm:$0xff]  ;;  %v728_v45 = vld [vmem:[%s3442_s5 + $0x9c0] sm:$0xff] }
 0x168   :  { %1187 = vmatpush.msra.mxu1 %v811_v46  ;;  %1129 = vmatpush.msrb.mxu2 %v461_v47  ;;  %v819_v46 = vld [vmem:[%s3442_s5 + $0xc98] sm:$0xff]  ;;  %v469_v47 = vld [vmem:[%s3442_s5 + $0x1a8] sm:$0xff] }
 0x169   :  { %1152 = vmatpush.msrb.mxu3 %v552_v48  ;;  %1165 = vmatpush.msra.mxu0 %v713_v49  ;;  %v560_v48 = vld [vmem:[%s3442_s5 + $0x480] sm:$0xff]  ;;  %v721_v49 = vld [vmem:[%s3442_s5 + $0x988] sm:$0xff] }
 0x16a   :  { %1188 = vmatpush.msra.mxu1 %v804_v50  ;;  %1130 = vmatpush.msrb.mxu2 %v454_v51  ;;  %v812_v50 = vld [vmem:[%s3442_s5 + $0xc60] sm:$0xff]  ;;  %v462_v51 = vld [vmem:[%s3442_s5 + $0x170] sm:$0xff] }
 0x16b   :  { %1153 = vmatpush.msrb.mxu3 %v545_v52  ;;  %1166 = vmatpush.msra.mxu0 %v706_v53  ;;  %v553_v52 = vld [vmem:[%s3442_s5 + $0x448] sm:$0xff]  ;;  %v714_v53 = vld [vmem:[%s3442_s5 + $0x950] sm:$0xff] }
 0x16c   :  { %1189 = vmatpush.msra.mxu1 %v797_v54  ;;  %1131 = vmatpush.msrb.mxu2 %v447_v55  ;;  %v805_v54 = vld [vmem:[%s3442_s5 + $0xc28] sm:$0xff]  ;;  %v455_v55 = vld [vmem:[%s3442_s5 + $0x138] sm:$0xff] }
 0x16d   :  { %1154 = vmatpush.msrb.mxu3 %v538_v57  ;;  %1167 = vmatpush.msra.mxu0 %v699_v58  ;;  %v546_v57 = vld [vmem:[%s3442_s5 + $0x410] sm:$0xff]  ;;  %v707_v58 = vld [vmem:[%s3442_s5 + $0x918] sm:$0xff] }
 0x16e   :  { %1190 = vmatpush.msra.mxu1 %v790_v59  ;;  %1132 = vmatpush.msrb.mxu2 %v440_v60  ;;  %v798_v59 = vld [vmem:[%s3442_s5 + $0xbf0] sm:$0xff]  ;;  %v448_v60 = vld [vmem:[%s3442_s5 + $0x100] sm:$0xff] }
 0x16f   :  { %1155 = vmatpush.msrb.mxu3 %v531_v61  ;;  %1168 = vmatpush.msra.mxu0 %v692_v62  ;;  %v539_v61 = vld [vmem:[%s3442_s5 + $0x3d8] sm:$0xff]  ;;  %v700_v62 = vld [vmem:[%s3442_s5 + $0x8e0] sm:$0xff] }
 0x170   :  { %1191 = vmatpush.msra.mxu1 %v783_v63  ;;  %1156 = vmatmul.f32.vlgmr.msrb.gmra.mxu3 %v2426_v56  ;;  %v791_v63 = vld [vmem:[%s3442_s5 + $0xbb8] sm:$0xff] }
 0x171   :  { %1220 = vmatpush.msra.mxu3 %v637_v0  ;;  %1133 = vmatpush.msrb.mxu2 %v433_v1  ;;  %v441_v0 = vld [vmem:[%s3442_s5 + $0xc8] sm:$0xff]  ;;  %v532_v1 = vld [vmem:[%s3442_s5 + $0x3a0] sm:$0xff] }
 0x172   :  { %1169 = vmatpush.msra.mxu0 %v685_v2  ;;  %1192 = vmatpush.msra.mxu1 %v776_v4  ;;  %v693_v2 = vld [vmem:[%s3442_s5 + $0x8a8] sm:$0xff]  ;;  %v784_v4 = vld [vmem:[%s3442_s5 + $0xb80] sm:$0xff] }
 0x173   :  { %1221 = vmatpush.msra.mxu3 %v630_v5  ;;  %1134 = vmatpush.msrb.mxu2 %v426_v6  ;;  %v638_v5 = vld [vmem:[%s3442_s5 + $0x6f0] sm:$0xff] }
 0x174   :  { %1170 = vmatpush.msra.mxu0 %v678_v7  ;;  %1193 = vmatpush.msra.mxu1 %v769_v8  ;;  %v434_v6 = vld [vmem:[%s3442_s5 + $0x90] sm:$0xff]  ;;  %v777_v8 = vld [vmem:[%s3442_s5 + $0xb48] sm:$0xff] }
 0x175   :  { %1222 = vmatpush.msra.mxu3 %v623_v10  ;;  %1135 = vmatpush.msrb.mxu2 %v419_v11  ;;  %v686_v7 = vld [vmem:[%s3442_s5 + $0x870] sm:$0xff]  ;;  %v631_v10 = vld [vmem:[%s3442_s5 + $0x6b8] sm:$0xff] }
 0x176   :  { %1171 = vmatpush.msra.mxu0 %v671_v12  ;;  %1194 = vmatpush.msra.mxu1 %v762_v13  ;;  %v427_v11 = vld [vmem:[%s3442_s5 + $0x58] sm:$0xff]  ;;  %v770_v13 = vld [vmem:[%s3442_s5 + $0xb10] sm:$0xff] }
 0x177   :  { %1136 = vmatmul.f32.vlgmr.msrb.gmra.mxu2 %v2438_v3  ;;  %1223 = vmatpush.msra.mxu3 %v616_v14  ;;  %v679_v12 = vld [vmem:[%s3442_s5 + $0x838] sm:$0xff]  ;;  %v624_v14 = vld [vmem:[%s3442_s5 + $0x680] sm:$0xff] }
 0x178   :  { %1200 = vmatpush.msra.mxu2 %v525_v15  ;;  %1172 = vmatpush.msra.mxu0 %v664_v16  ;;  %v420_v15 = vld [vmem:[%s3442_s5 + $0x20] sm:$0xff] }
 0x179   :  { %1195 = vmatpush.msra.mxu1 %v755_v17  ;;  %1224 = vmatpush.msra.mxu3 %v609_v18  ;;  %v672_v16 = vld [vmem:[%s3442_s5 + $0x800] sm:$0xff]  ;;  %v763_v17 = vld [vmem:[%s3442_s5 + $0xad8] sm:$0xff]  ;;  %v617_v18 = vld [vmem:[%s3442_s5 + $0x648] sm:$0xff] }
 0x17a   :  { %1196 = vmatmul.f32.vlgmr.msra.gmra.mxu1 %v2447_v9  ;;  %1201 = vmatpush.msra.mxu2 %v518_v19  ;;  %v526_v19 = vld [vmem:[%s3442_s5 + $0x370] sm:$0xff] }
 0x17b   :  { %1260 = vmatpush.msrb.mxu1 %v861_v20  ;;  %1173 = vmatpush.msra.mxu0 %v657_v22  ;;  %v665_v20 = vld [vmem:[%s3442_s5 + $0x7c8] sm:$0xff]  ;;  %v756_v22 = vld [vmem:[%s3442_s5 + $0xaa0] sm:$0xff] }
 0x17c   :  { %1202 = vmatpush.msra.mxu2 %v511_v23  ;;  %1225 = vmatpush.msra.mxu3 %v602_v24  ;;  %v610_v23 = vld [vmem:[%s3442_s5 + $0x610] sm:$0xff]  ;;  %v519_v24 = vld [vmem:[%s3442_s5 + $0x338] sm:$0xff] }
 0x17d   :  { %1261 = vmatpush.msrb.mxu1 %v854_v25  ;;  %1174 = vmatpush.msra.mxu0 %v650_v26  ;;  %v862_v25 = vld [vmem:[%s3442_s5 + $0xdf0] sm:$0xff] }
 0x17e   :  { %1203 = vmatpush.msra.mxu2 %v504_v27  ;;  %1226 = vmatpush.msra.mxu3 %v595_v28  ;;  %v658_v26 = vld [vmem:[%s3442_s5 + $0x790] sm:$0xff]  ;;  %v512_v27 = vld [vmem:[%s3442_s5 + $0x300] sm:$0xff]  ;;  %v603_v28 = vld [vmem:[%s3442_s5 + $0x5d8] sm:$0xff] }
 0x17f   :  { %1262 = vmatpush.msrb.mxu1 %v847_v29  ;;  %1175 = vmatpush.msra.mxu0 %v643_v30  ;;  %v855_v29 = vld [vmem:[%s3442_s5 + $0xdb8] sm:$0xff] }
 0x180   :  { %1176 = vmatmul.f32.vlgmr.msra.gmra.mxu0 %v2475_v21  ;;  %1204 = vmatpush.msra.mxu2 %v497_v31  ;;  %v651_v30 = vld [vmem:[%s3442_s5 + $0x758] sm:$0xff]  ;;  %v505_v31 = vld [vmem:[%s3442_s5 + $0x2c8] sm:$0xff] }
 0x181   :  { %1227 = vmatpush.msra.mxu3 %v588_v32  ;;  %1240 = vmatpush.msrb.mxu0 %v749_v33  ;;  %v596_v32 = vld [vmem:[%s3442_s5 + $0x5a0] sm:$0xff] }
 0x182   :  { %1263 = vmatpush.msrb.mxu1 %v840_v34  ;;  %1205 = vmatpush.msra.mxu2 %v490_v35  ;;  %v848_v33 = vld [vmem:[%s3442_s5 + $0xd80] sm:$0xff]  ;;  %v498_v35 = vld [vmem:[%s3442_s5 + $0x290] sm:$0xff] }
 0x183   :  { %1228 = vmatpush.msra.mxu3 %v581_v36  ;;  %1241 = vmatpush.msrb.mxu0 %v742_v37  ;;  %v644_v34 = vld [vmem:[%s3442_s5 + $0x720] sm:$0xff]  ;;  %v589_v36 = vld [vmem:[%s3442_s5 + $0x568] sm:$0xff]  ;;  %v750_v37 = vld [vmem:[%s3442_s5 + $0xa70] sm:$0xff] }
 0x184   :  { %1264 = vmatpush.msrb.mxu1 %v833_v38  ;;  %1206 = vmatpush.msra.mxu2 %v483_v39  ;;  %v841_v38 = vld [vmem:[%s3442_s5 + $0xd48] sm:$0xff]  ;;  %v491_v39 = vld [vmem:[%s3442_s5 + $0x258] sm:$0xff] }
 0x185   :  { %1229 = vmatpush.msra.mxu3 %v574_v40  ;;  %1242 = vmatpush.msrb.mxu0 %v735_v41  ;;  %v582_v40 = vld [vmem:[%s3442_s5 + $0x530] sm:$0xff]  ;;  %v743_v41 = vld [vmem:[%s3442_s5 + $0xa38] sm:$0xff] }
 0x186   :  { %1265 = vmatpush.msrb.mxu1 %v826_v42  ;;  %1207 = vmatpush.msra.mxu2 %v476_v43  ;;  %v834_v42 = vld [vmem:[%s3442_s5 + $0xd10] sm:$0xff]  ;;  %v484_v43 = vld [vmem:[%s3442_s5 + $0x220] sm:$0xff] }
 0x187   :  { %1230 = vmatpush.msra.mxu3 %v567_v44  ;;  %1243 = vmatpush.msrb.mxu0 %v728_v45  ;;  %v575_v44 = vld [vmem:[%s3442_s5 + $0x4f8] sm:$0xff]  ;;  %v736_v45 = vld [vmem:[%s3442_s5 + $0xa00] sm:$0xff] }
 0x188   :  { %1266 = vmatpush.msrb.mxu1 %v819_v46  ;;  %1208 = vmatpush.msra.mxu2 %v469_v47  ;;  %v827_v46 = vld [vmem:[%s3442_s5 + $0xcd8] sm:$0xff]  ;;  %v477_v47 = vld [vmem:[%s3442_s5 + $0x1e8] sm:$0xff] }
 0x189   :  { %1231 = vmatpush.msra.mxu3 %v560_v48  ;;  %1244 = vmatpush.msrb.mxu0 %v721_v49  ;;  %v568_v48 = vld [vmem:[%s3442_s5 + $0x4c0] sm:$0xff]  ;;  %v729_v49 = vld [vmem:[%s3442_s5 + $0x9c8] sm:$0xff] }
 0x18a   :  { %1267 = vmatpush.msrb.mxu1 %v812_v50  ;;  %1209 = vmatpush.msra.mxu2 %v462_v51  ;;  %v820_v50 = vld [vmem:[%s3442_s5 + $0xca0] sm:$0xff]  ;;  %v470_v51 = vld [vmem:[%s3442_s5 + $0x1b0] sm:$0xff] }
 0x18b   :  { %1232 = vmatpush.msra.mxu3 %v553_v52  ;;  %1245 = vmatpush.msrb.mxu0 %v714_v53  ;;  %v561_v52 = vld [vmem:[%s3442_s5 + $0x488] sm:$0xff]  ;;  %v722_v53 = vld [vmem:[%s3442_s5 + $0x990] sm:$0xff] }
 0x18c   :  { %1268 = vmatpush.msrb.mxu1 %v805_v54  ;;  %1210 = vmatpush.msra.mxu2 %v455_v55  ;;  %v813_v54 = vld [vmem:[%s3442_s5 + $0xc68] sm:$0xff]  ;;  %v463_v55 = vld [vmem:[%s3442_s5 + $0x178] sm:$0xff] }
 0x18d   :  { %1233 = vmatpush.msra.mxu3 %v546_v57  ;;  %1246 = vmatpush.msrb.mxu0 %v707_v58  ;;  %v554_v57 = vld [vmem:[%s3442_s5 + $0x450] sm:$0xff]  ;;  %v715_v58 = vld [vmem:[%s3442_s5 + $0x958] sm:$0xff] }
 0x18e   :  { %1269 = vmatpush.msrb.mxu1 %v798_v59  ;;  %1211 = vmatpush.msra.mxu2 %v448_v60  ;;  %v806_v59 = vld [vmem:[%s3442_s5 + $0xc30] sm:$0xff]  ;;  %v456_v60 = vld [vmem:[%s3442_s5 + $0x140] sm:$0xff] }
 0x18f   :  { %1234 = vmatpush.msra.mxu3 %v539_v61  ;;  %1247 = vmatpush.msrb.mxu0 %v700_v62  ;;  %v547_v61 = vld [vmem:[%s3442_s5 + $0x418] sm:$0xff]  ;;  %v708_v62 = vld [vmem:[%s3442_s5 + $0x920] sm:$0xff] }
 0x190   :  { %1270 = vmatpush.msrb.mxu1 %v791_v63  ;;  %1212 = vmatpush.msra.mxu2 %v441_v0  ;;  %v799_v63 = vld [vmem:[%s3442_s5 + $0xbf8] sm:$0xff]  ;;  %v449_v0 = vld [vmem:[%s3442_s5 + $0x108] sm:$0xff] }
 0x191   :  { %1235 = vmatpush.msra.mxu3 %v532_v1  ;;  %1248 = vmatpush.msrb.mxu0 %v693_v2  ;;  %v540_v1 = vld [vmem:[%s3442_s5 + $0x3e0] sm:$0xff]  ;;  %v701_v2 = vld [vmem:[%s3442_s5 + $0x8e8] sm:$0xff] }
 0x192   :  { %1271 = vmatpush.msrb.mxu1 %v784_v4  ;;  %1236 = vmatmul.f32.vlgmr.msra.gmra.mxu3 %v2426_v56  ;;  %v3168_v4 = vld [vmem:[%s3443_s6] sm:$0x7f] }
 0x193   :  { %1300 = vmatpush.msrb.mxu3 %v638_v5  ;;  %1213 = vmatpush.msra.mxu2 %v434_v6  ;;  %v792_v5 = vld [vmem:[%s3442_s5 + $0xbc0] sm:$0xff]  ;;  %v442_v6 = vld [vmem:[%s3442_s5 + $0xd0] sm:$0xff] }
 0x194   :  { %1249 = vmatpush.msrb.mxu0 %v686_v7  ;;  %1272 = vmatpush.msrb.mxu1 %v777_v8  ;;  %v533_v7 = vld [vmem:[%s3442_s5 + $0x3a8] sm:$0xff]  ;;  %v694_v8 = vld [vmem:[%s3442_s5 + $0x8b0] sm:$0xff] }
 0x195   :  { %1301 = vmatpush.msrb.mxu3 %v631_v10  ;;  %1214 = vmatpush.msra.mxu2 %v427_v11  ;;  %v785_v10 = vld [vmem:[%s3442_s5 + $0xb88] sm:$0xff]  ;;  %v866_v11 = vperm.slane %v3168_v4, 0 }
 0x196   :  { %1250 = vmatpush.msrb.mxu0 %v679_v12  ;;  %1273 = vmatpush.msrb.mxu1 %v770_v13  ;;  %v639_v12 = vld [vmem:[%s3442_s5 + $0x6f8] sm:$0xff] }
 0x197   :  { %1302 = vmatpush.msrb.mxu3 %v624_v14  ;;  %1215 = vmatpush.msra.mxu2 %v420_v15  ;;  %v435_v13 = vld [vmem:[%s3442_s5 + $0x98] sm:$0xff]  ;;  %v778_v15 = vld [vmem:[%s3442_s5 + $0xb50] sm:$0xff] }
 0x198   :  { %1251 = vmatpush.msrb.mxu0 %v672_v16  ;;  %1274 = vmatpush.msrb.mxu1 %v763_v17  ;;  %v687_v14 = vld [vmem:[%s3442_s5 + $0x878] sm:$0xff]  ;;  %v632_v16 = vld [vmem:[%s3442_s5 + $0x6c0] sm:$0xff] }
 0x199   :  { %1216 = vmatmul.f32.vlgmr.msra.gmra.mxu2 %v2438_v3  ;;  %1303 = vmatpush.msrb.mxu3 %v617_v18  ;;  %v428_v17 = vld [vmem:[%s3442_s5 + $0x60] sm:$0xff] }
 0x19a   :  { %1280 = vmatpush.msrb.mxu2 %v526_v19  ;;  %1252 = vmatpush.msrb.mxu0 %v665_v20  ;;  %v680_v19 = vld [vmem:[%s3442_s5 + $0x840] sm:$0xff]  ;;  %v771_v20 = vld [vmem:[%s3442_s5 + $0xb18] sm:$0xff] }
 0x19b   :  { %1275 = vmatpush.msrb.mxu1 %v756_v22  ;;  %1304 = vmatpush.msrb.mxu3 %v610_v23  ;;  %v625_v23 = vld [vmem:[%s3442_s5 + $0x688] sm:$0xff] }
 0x19c   :  { %1276 = vmatmul.f32.vlgmr.msrb.gmra.mxu1 %v2447_v9  ;;  %1281 = vmatpush.msrb.mxu2 %v519_v24  ;;  %v421_v24 = vld [vmem:[%s3442_s5 + $0x28] sm:$0xff] }
 0x19d   :  { %1340 = vmatpush.msra.mxu1 %v862_v25  ;;  %1253 = vmatpush.msrb.mxu0 %v658_v26  ;;  %v673_v26 = vld [vmem:[%s3442_s5 + $0x808] sm:$0xff] }
 0x19e   :  { %1282 = vmatpush.msrb.mxu2 %v512_v27  ;;  %1305 = vmatpush.msrb.mxu3 %v603_v28  ;;  %v764_v27 = vld [vmem:[%s3442_s5 + $0xae0] sm:$0xff] }
 0x19f   :  { %1341 = vmatpush.msra.mxu1 %v855_v29  ;;  %1254 = vmatpush.msrb.mxu0 %v651_v30  ;;  %v618_v29 = vld [vmem:[%s3442_s5 + $0x650] sm:$0xff] }
 0x1a0   :  { %1283 = vmatpush.msrb.mxu2 %v505_v31  ;;  %1306 = vmatpush.msrb.mxu3 %v596_v32  ;;  %v527_v31 = vld [vmem:[%s3442_s5 + $0x378] sm:$0xff]  ;;  %v666_v32 = vld [vmem:[%s3442_s5 + $0x7d0] sm:$0xff] }
 0x1a1   :  { %1342 = vmatpush.msra.mxu1 %v848_v33  ;;  %1255 = vmatpush.msrb.mxu0 %v644_v34  ;;  %v757_v34 = vld [vmem:[%s3442_s5 + $0xaa8] sm:$0xff] }
 0x1a2   :  { %1256 = vmatmul.f32.vlgmr.msrb.gmra.mxu0 %v2475_v21  ;;  %1284 = vmatpush.msrb.mxu2 %v498_v35  ;;  %v611_v35 = vld [vmem:[%s3442_s5 + $0x618] sm:$0xff] }
 0x1a3   :  { %1307 = vmatpush.msrb.mxu3 %v589_v36  ;;  %1320 = vmatpush.msra.mxu0 %v750_v37  ;;  %v520_v37 = vld [vmem:[%s3442_s5 + $0x340] sm:$0xff] }
 0x1a4   :  { %1343 = vmatpush.msra.mxu1 %v841_v38  ;;  %1285 = vmatpush.msrb.mxu2 %v491_v39  ;;  %v867_v39 = vperm.slane %v3168_v4, 1 }
 0x1a5   :  { %1308 = vmatpush.msrb.mxu3 %v582_v40  ;;  %1321 = vmatpush.msra.mxu0 %v743_v41  ;;  %v863_v40 = vld [vmem:[%s3442_s5 + $0xdf8] sm:$0xff] }
 0x1a6   :  { %1344 = vmatpush.msra.mxu1 %v834_v42  ;;  %1286 = vmatpush.msrb.mxu2 %v484_v43  ;;  %v659_v41 = vld [vmem:[%s3442_s5 + $0x798] sm:$0xff]  ;;  %v513_v42 = vld [vmem:[%s3442_s5 + $0x308] sm:$0xff]  ;;  %v604_v43 = vld [vmem:[%s3442_s5 + $0x5e0] sm:$0xff] }
 0x1a7   :  { %1309 = vmatpush.msrb.mxu3 %v575_v44  ;;  %1322 = vmatpush.msra.mxu0 %v736_v45  ;;  %v856_v44 = vld [vmem:[%s3442_s5 + $0xdc0] sm:$0xff] }
 0x1a8   :  { %1345 = vmatpush.msra.mxu1 %v827_v46  ;;  %1287 = vmatpush.msrb.mxu2 %v477_v47  ;;  %v652_v45 = vld [vmem:[%s3442_s5 + $0x760] sm:$0xff]  ;;  %v506_v47 = vld [vmem:[%s3442_s5 + $0x2d0] sm:$0xff] }
 0x1a9   :  { %1310 = vmatpush.msrb.mxu3 %v568_v48  ;;  %1323 = vmatpush.msra.mxu0 %v729_v49  ;;  %v597_v48 = vld [vmem:[%s3442_s5 + $0x5a8] sm:$0xff] }
 0x1aa   :  { %1346 = vmatpush.msra.mxu1 %v820_v50  ;;  %1288 = vmatpush.msrb.mxu2 %v470_v51  ;;  %v849_v50 = vld [vmem:[%s3442_s5 + $0xd88] sm:$0xff] }
 0x1ab   :  { %1311 = vmatpush.msrb.mxu3 %v561_v52  ;;  %1324 = vmatpush.msra.mxu0 %v722_v53  ;;  %v645_v51 = vld [vmem:[%s3442_s5 + $0x728] sm:$0xff]  ;;  %v499_v53 = vld [vmem:[%s3442_s5 + $0x298] sm:$0xff] }
 0x1ac   :  { %1347 = vmatpush.msra.mxu1 %v813_v54  ;;  %1289 = vmatpush.msrb.mxu2 %v463_v55  ;;  %v590_v55 = vld [vmem:[%s3442_s5 + $0x570] sm:$0xff] }
 0x1ad   :  { %1312 = vmatpush.msrb.mxu3 %v554_v57  ;;  %1325 = vmatpush.msra.mxu0 %v715_v58  ;;  %v751_v57 = vld [vmem:[%s3442_s5 + $0xa78] sm:$0xff] }
 0x1ae   :  { %1348 = vmatpush.msra.mxu1 %v806_v59  ;;  %1290 = vmatpush.msrb.mxu2 %v456_v60  ;;  %v842_v60 = vld [vmem:[%s3442_s5 + $0xd50] sm:$0xff] }
 0x1af   :  { %1313 = vmatpush.msrb.mxu3 %v547_v61  ;;  %1326 = vmatpush.msra.mxu0 %v708_v62  ;;  %v917_v25 = vpop.f32.mrf.mxu3  ;;  %v492_v61 = vld [vmem:[%s3442_s5 + $0x260] sm:$0xff] }
 0x1b0   :  { %1349 = vmatpush.msra.mxu1 %v799_v63  ;;  %1291 = vmatpush.msrb.mxu2 %v449_v0  ;;  %v583_v63 = vld [vmem:[%s3442_s5 + $0x538] sm:$0xff]  ;;  %v744_v0 = vld [vmem:[%s3442_s5 + $0xa40] sm:$0xff] }
 0x1b1   :  { %1314 = vmatpush.msrb.mxu3 %v540_v1  ;;  %1327 = vmatpush.msra.mxu0 %v701_v2  ;;  %v957_v36 = vpop.f32.mrf.mxu1  ;;  %v835_v2 = vld [vmem:[%s3442_s5 + $0xd18] sm:$0xff] }
 0x1b2   :  { %1350 = vmatpush.msra.mxu1 %v792_v5  ;;  %1292 = vmatpush.msrb.mxu2 %v442_v6  ;;  %v485_v5 = vld [vmem:[%s3442_s5 + $0x228] sm:$0xff] }
 0x1b3   :  { %1315 = vmatpush.msrb.mxu3 %v533_v7  ;;  %1328 = vmatpush.msra.mxu0 %v694_v8  ;;  %v576_v7 = vld [vmem:[%s3442_s5 + $0x500] sm:$0xff]  ;;  %v737_v8 = vld [vmem:[%s3442_s5 + $0xa08] sm:$0xff] }
 0x1b4   :  { %1351 = vmatpush.msra.mxu1 %v785_v10  ;;  %1316 = vmatmul.f32.vlgmr.msrb.gmra.mxu3 %v2426_v56  ;;  %v897_v18 = vpop.f32.mrf.mxu2  ;;  %v828_v10 = vld [vmem:[%s3442_s5 + $0xce0] sm:$0xff] }
 0x1b5   :  { %1380 = vmatpush.msra.mxu3 %v639_v12  ;;  %1293 = vmatpush.msrb.mxu2 %v435_v13  ;;  %v898_v22 = vadd.f32 %v897_v18, %v866_v11  ;;  %v478_v11 = vld [vmem:[%s3442_s5 + $0x1f0] sm:$0xff]  ;;  %v569_v12 = vld [vmem:[%s3442_s5 + $0x4c8] sm:$0xff] }
 0x1b6   :  { %1329 = vmatpush.msra.mxu0 %v687_v14  ;;  %1352 = vmatpush.msra.mxu1 %v778_v15  ;;  %v730_v13 = vld [vmem:[%s3442_s5 + $0x9d0] sm:$0xff]  ;;  %v821_v14 = vld [vmem:[%s3442_s5 + $0xca8] sm:$0xff]  ;;  %v471_v15 = vld [vmem:[%s3442_s5 + $0x1b8] sm:$0xff] }
 0x1b7   :  { %1381 = vmatpush.msra.mxu3 %v632_v16  ;;  %1294 = vmatpush.msrb.mxu2 %v428_v17  ;;  %v918_v28 = vadd.f32 %v917_v25, %v898_v22  ;;  %v937_v30 = vpop.f32.mrf.mxu0  ;;  %v997_v52 = vpop.f32.mrf.mxu3  ;;  %v562_v16 = vld [vmem:[%s3442_s5 + $0x490] sm:$0xff]  ;;  %v723_v17 = vld [vmem:[%s3442_s5 + $0x998] sm:$0xff]  ;;  %v716_v22 = vld [vmem:[%s3442_s5 + $0x960] sm:$0xff] }
 0x1b8   :  { %1330 = vmatpush.msra.mxu0 %v680_v19  ;;  %1353 = vmatpush.msra.mxu1 %v771_v20  ;;  %v814_v18 = vld [vmem:[%s3442_s5 + $0xc70] sm:$0xff]  ;;  %v464_v19 = vld [vmem:[%s3442_s5 + $0x180] sm:$0xff]  ;;  %v555_v20 = vld [vmem:[%s3442_s5 + $0x458] sm:$0xff] }
 0x1b9   :  { %1382 = vmatpush.msra.mxu3 %v625_v23  ;;  %1295 = vmatpush.msrb.mxu2 %v421_v24  ;;  %v938_v33 = vadd.f32 %v937_v30, %v918_v28  ;;  %v807_v24 = vld [vmem:[%s3442_s5 + $0xc38] sm:$0xff]  ;;  %v457_v25 = vld [vmem:[%s3442_s5 + $0x148] sm:$0xff]  ;;  %v800_v28 = vld [vmem:[%s3442_s5 + $0xc00] sm:$0xff] }
 0x1ba   :  { %1331 = vmatpush.msra.mxu0 %v673_v26  ;;  %1354 = vmatpush.msra.mxu1 %v764_v27  ;;  %v548_v26 = vld [vmem:[%s3442_s5 + $0x420] sm:$0xff]  ;;  %v709_v27 = vld [vmem:[%s3442_s5 + $0x928] sm:$0xff] }
 0x1bb   :  { %1296 = vmatmul.f32.vlgmr.msrb.gmra.mxu2 %v2438_v3  ;;  %1383 = vmatpush.msra.mxu3 %v618_v29  ;;  %v958_v38 = vadd.f32 %v957_v36, %v938_v33  ;;  %v1037_v1 = vpop.f32.mrf.mxu1  ;;  %v450_v29 = vld [vmem:[%s3442_s5 + $0x110] sm:$0xff]  ;;  %v541_v30 = vld [vmem:[%s3442_s5 + $0x3e8] sm:$0xff]  ;;  %v443_v33 = vld [vmem:[%s3442_s5 + $0xd8] sm:$0xff] }
 0x1bc   :  { %1360 = vmatpush.msra.mxu2 %v527_v31  ;;  %1332 = vmatpush.msra.mxu0 %v666_v32  ;;  %v702_v31 = vld [vmem:[%s3442_s5 + $0x8f0] sm:$0xff]  ;;  %v793_v32 = vld [vmem:[%s3442_s5 + $0xbc8] sm:$0xff] }
 0x1bd   :  { %1355 = vmatpush.msra.mxu1 %v757_v34  ;;  %1384 = vmatpush.msra.mxu3 %v611_v35  ;;  %1472 = vtanh.f32 %v958_v38  ;;  %v534_v34 = vld [vmem:[%s3442_s5 + $0x3b0] sm:$0xff]  ;;  %v695_v35 = vld [vmem:[%s3442_s5 + $0x8b8] sm:$0xff]  ;;  %v688_v38 = vld [vmem:[%s3442_s5 + $0x880] sm:$0xff] }
 0x1be   :  { %1356 = vmatmul.f32.vlgmr.msra.gmra.mxu1 %v2447_v9  ;;  %1361 = vmatpush.msra.mxu2 %v520_v37  ;;  %v977_v46 = vpop.f32.mrf.mxu2  ;;  %v786_v36 = vld [vmem:[%s3442_s5 + $0xb90] sm:$0xff]  ;;  %v436_v37 = vld [vmem:[%s3442_s5 + $0xa0] sm:$0xff] }
 0x1bf   :  { %1420 = vmatpush.msrb.mxu1 %v863_v40  ;;  %1333 = vmatpush.msra.mxu0 %v659_v41  ;;  %v978_v49 = vadd.f32 %v977_v46, %v867_v39  ;;  %v779_v39 = vld [vmem:[%s3442_s5 + $0xb58] sm:$0xff]  ;;  %v868_v40 = vperm.slane %v3168_v4, 2  ;;  %v429_v41 = vld [vmem:[%s3442_s5 + $0x68] sm:$0xff] }
 0x1c0   :  { %1362 = vmatpush.msra.mxu2 %v513_v42  ;;  %1385 = vmatpush.msra.mxu3 %v604_v43  ;;  %v681_v42 = vld [vmem:[%s3442_s5 + $0x848] sm:$0xff]  ;;  %v772_v43 = vld [vmem:[%s3442_s5 + $0xb20] sm:$0xff] }
 0x1c1   :  { %1421 = vmatpush.msrb.mxu1 %v856_v44  ;;  %1334 = vmatpush.msra.mxu0 %v652_v45  ;;  %v998_v54 = vadd.f32 %v997_v52, %v978_v49  ;;  %v1017_v58 = vpop.f32.mrf.mxu0  ;;  %v422_v44 = vld [vmem:[%s3442_s5 + $0x30] sm:$0xff]  ;;  %v765_v46 = vld [vmem:[%s3442_s5 + $0xae8] sm:$0xff]  ;;  %v667_v49 = vld [vmem:[%s3442_s5 + $0x7d8] sm:$0xff] }
 0x1c2   :  { %1363 = vmatpush.msra.mxu2 %v506_v47  ;;  %1386 = vmatpush.msra.mxu3 %v597_v48  ;;  %v660_v52 = vld [vmem:[%s3442_s5 + $0x7a0] sm:$0xff] }
 0x1c3   :  { %v1473_v59 = vpop.eup %1472  ;;  %1422 = vmatpush.msrb.mxu1 %v849_v50  ;;  %1335 = vmatpush.msra.mxu0 %v645_v51  ;;  %v1018_v62 = vadd.f32 %v1017_v58, %v998_v54  ;;  %v758_v50 = vld [vmem:[%s3442_s5 + $0xab0] sm:$0xff] }
 0x1c4   :  { %1336 = vmatmul.f32.vlgmr.msra.gmra.mxu0 %v2475_v21  ;;  %1364 = vmatpush.msra.mxu2 %v499_v53  ;;  %1447 = vst [vmem:[#allocation2] sm:$0xff] %v1473_v59 }
 0x1c5   :  { %1387 = vmatpush.msra.mxu3 %v590_v55  ;;  %1400 = vmatpush.msrb.mxu0 %v751_v57  ;;  %v1038_v6 = vadd.f32 %v1037_v1, %v1018_v62  ;;  %v653_v57 = vld [vmem:[%s3442_s5 + $0x768] sm:$0xff] }
 0x1c6   :  { %1423 = vmatpush.msrb.mxu1 %v842_v60  ;;  %1365 = vmatpush.msra.mxu2 %v492_v61  ;;  %v869_v60 = vperm.slane %v3168_v4, 3 }
 0x1c7   :  { %1388 = vmatpush.msra.mxu3 %v583_v63  ;;  %1401 = vmatpush.msrb.mxu0 %v744_v0  ;;  %1474 = vtanh.f32 %v1038_v6 }
 0x1c8   :  { %1424 = vmatpush.msrb.mxu1 %v835_v2  ;;  %1366 = vmatpush.msra.mxu2 %v485_v5 }
 0x1c9   :  { %1389 = vmatpush.msra.mxu3 %v576_v7  ;;  %1402 = vmatpush.msrb.mxu0 %v737_v8  ;;  %v870_v7 = vperm.slane %v3168_v4, 4 }
 0x1ca   :  { %1425 = vmatpush.msrb.mxu1 %v828_v10  ;;  %1367 = vmatpush.msra.mxu2 %v478_v11 }
 0x1cb   :  { %1390 = vmatpush.msra.mxu3 %v569_v12  ;;  %1403 = vmatpush.msrb.mxu0 %v730_v13 }
 0x1cc   :  { %1426 = vmatpush.msrb.mxu1 %v821_v14  ;;  %1368 = vmatpush.msra.mxu2 %v471_v15 }
 0x1cd   :  { %v1475_v23 = vpop.eup %1474  ;;  %1391 = vmatpush.msra.mxu3 %v562_v16  ;;  %1404 = vmatpush.msrb.mxu0 %v723_v17  ;;  %v871_v17 = vperm.slane %v3168_v4, 5 }
 0x1ce   :  { %1427 = vmatpush.msrb.mxu1 %v814_v18  ;;  %1448 = vst [vmem:[#allocation2 + $0x8] sm:$0xff] %v1475_v23  ;;  %1369 = vmatpush.msra.mxu2 %v464_v19 }
 0x1cf   :  { %1392 = vmatpush.msra.mxu3 %v555_v20  ;;  %1405 = vmatpush.msrb.mxu0 %v716_v22 }
 0x1d0   :  { %1428 = vmatpush.msrb.mxu1 %v807_v24  ;;  %1370 = vmatpush.msra.mxu2 %v457_v25 }
 0x1d1   :  { %1393 = vmatpush.msra.mxu3 %v548_v26  ;;  %1406 = vmatpush.msrb.mxu0 %v709_v27  ;;  %v1077_v48 = vpop.f32.mrf.mxu3 }
 0x1d2   :  { %1429 = vmatpush.msrb.mxu1 %v800_v28  ;;  %1371 = vmatpush.msra.mxu2 %v450_v29  ;;  %v872_v28 = vperm.slane %v3168_v4, 6 }
 0x1d3   :  { %1394 = vmatpush.msra.mxu3 %v541_v30  ;;  %1407 = vmatpush.msrb.mxu0 %v702_v31 }
 0x1d4   :  { %1430 = vmatpush.msrb.mxu1 %v793_v32  ;;  %1372 = vmatpush.msra.mxu2 %v443_v33 }
 0x1d5   :  { %1395 = vmatpush.msra.mxu3 %v534_v34  ;;  %1408 = vmatpush.msrb.mxu0 %v695_v35  ;;  %v1117_v55 = vpop.f32.mrf.mxu1 }
 0x1d6   :  { %1431 = vmatpush.msrb.mxu1 %v786_v36  ;;  %1396 = vmatmul.f32.vlgmr.msra.gmra.mxu3 %v2426_v56  ;;  %v674_v56 = vld [vmem:[%s3442_s5 + $0x810] sm:$0xff] }
 0x1d7   :  { %1373 = vmatpush.msra.mxu2 %v436_v37  ;;  %1409 = vmatpush.msrb.mxu0 %v688_v38 }
 0x1d8   :  { %1432 = vmatpush.msrb.mxu1 %v779_v39  ;;  %v1057_v45 = vpop.f32.mrf.mxu2 }
 0x1d9   :  { %1374 = vmatpush.msra.mxu2 %v429_v41  ;;  %1410 = vmatpush.msrb.mxu0 %v681_v42  ;;  %v1058_v47 = vadd.f32 %v1057_v45, %v868_v40 }
 0x1da   :  { %1433 = vmatpush.msrb.mxu1 %v772_v43 }
 0x1db   :  { %1375 = vmatpush.msra.mxu2 %v422_v44  ;;  %1411 = vmatpush.msrb.mxu0 %v674_v56  ;;  %v1078_v51 = vadd.f32 %v1077_v48, %v1058_v47  ;;  %v1097_v53 = vpop.f32.mrf.mxu0 }
 0x1dc   :  { %1434 = vmatpush.msrb.mxu1 %v765_v46  ;;  %1376 = vmatmul.f32.vlgmr.msra.gmra.mxu2 %v2438_v3  ;;  %v646_v3 = vld [vmem:[%s3442_s5 + $0x730] sm:$0xff]  ;;  %s1512_s5 = smov [#allocation2]  }
 0x1dd   :  { %1412 = vmatpush.msrb.mxu0 %v667_v49  ;;  %v1098_v54 = vadd.f32 %v1097_v53, %v1078_v51  ;;  %s1460_s13 = sshll.u32 %s1512_s5, 4  ;;  %s1461_s13 = int_to_ptr.vmem [resolvable:$true] %s1460_s13 }
 0x1de   :  { %1435 = vmatpush.msrb.mxu1 %v758_v50 }
 0x1df   :  { %1436 = vmatmul.f32.vlgmr.msrb.gmra.mxu1 %v2447_v9  ;;  %1413 = vmatpush.msrb.mxu0 %v660_v52  ;;  %v1118_v58 = vadd.f32 %v1117_v55, %v1098_v54 }
 0x1e1   :  { %1414 = vmatpush.msrb.mxu0 %v653_v57  ;;  %1476 = vtanh.f32 %v1118_v58 }
 0x1e3   :  { %1415 = vmatpush.msrb.mxu0 %v646_v3 }
 0x1e4   :  { %1416 = vmatmul.f32.vlgmr.msrb.gmra.mxu0 %v2475_v21 }
 0x1e7   :  { %v1477_v59 = vpop.eup %1476 }
 0x1e8   :  { %1449 = vst [vmem:[#allocation2 + $0x10] sm:$0xff] %v1477_v59 }
 0x1f3   :  { %v1157_v63 = vpop.f32.mrf.mxu3 }
 0x1f7   :  { %v1197_v2 = vpop.f32.mrf.mxu1 }
 0x1fa   :  { %v1137_v61 = vpop.f32.mrf.mxu2 }
 0x1fb   :  { %v1138_v62 = vadd.f32 %v1137_v61, %v869_v60 }
 0x1fd   :  { %v1158_v0 = vadd.f32 %v1157_v63, %v1138_v62  ;;  %v1177_v9 = vpop.f32.mrf.mxu0 }
 0x1ff   :  { %v1178_v1 = vadd.f32 %v1177_v9, %v1158_v0 }
 0x201   :  { %v1198_v5 = vadd.f32 %v1197_v2, %v1178_v1 }
 0x203   :  { %1478 = vtanh.f32 %v1198_v5 }
 0x209   :  { %v1479_v6 = vpop.eup %1478 }
 0x20a   :  { %1450 = vst [vmem:[#allocation2 + $0x18] sm:$0xff] %v1479_v6 }
 0x215   :  { %v1237_v21 = vpop.f32.mrf.mxu3 }
 0x219   :  { %v1277_v14 = vpop.f32.mrf.mxu1 }
 0x21c   :  { %v1217_v8 = vpop.f32.mrf.mxu2 }
 0x21d   :  { %v1218_v10 = vadd.f32 %v1217_v8, %v870_v7 }
 0x21f   :  { %v1238_v11 = vadd.f32 %v1237_v21, %v1218_v10  ;;  %v1257_v12 = vpop.f32.mrf.mxu0 }
 0x221   :  { %v1258_v13 = vadd.f32 %v1257_v12, %v1238_v11 }
 0x223   :  { %v1278_v15 = vadd.f32 %v1277_v14, %v1258_v13 }
 0x225   :  { %1480 = vtanh.f32 %v1278_v15 }
 0x22b   :  { %v1481_v16 = vpop.eup %1480 }
 0x22c   :  { %1451 = vst [vmem:[#allocation2 + $0x20] sm:$0xff] %v1481_v16 }
 0x237   :  { %v1317_v20 = vpop.f32.mrf.mxu3 }
 0x23b   :  { %v1357_v25 = vpop.f32.mrf.mxu1 }
 0x23e   :  { %v1297_v18 = vpop.f32.mrf.mxu2 }
 0x23f   :  { %v1298_v19 = vadd.f32 %v1297_v18, %v871_v17 }
 0x241   :  { %v1318_v22 = vadd.f32 %v1317_v20, %v1298_v19  ;;  %v1337_v23 = vpop.f32.mrf.mxu0 }
 0x243   :  { %v1338_v24 = vadd.f32 %v1337_v23, %v1318_v22 }
 0x245   :  { %v1358_v26 = vadd.f32 %v1357_v25, %v1338_v24 }
 0x247   :  { %1482 = vtanh.f32 %v1358_v26 }
 0x24d   :  { %v1483_v27 = vpop.eup %1482 }
 0x24e   :  { %1452 = vst [vmem:[#allocation2 + $0x28] sm:$0xff] %v1483_v27 }
 0x259   :  { %v1397_v31 = vpop.f32.mrf.mxu3 }
 0x25c   :  { %v1437_v35 = vpop.f32.mrf.mxu1 }
 0x25f   :  { %v1377_v29 = vpop.f32.mrf.mxu2 }
 0x260   :  { %v1378_v30 = vadd.f32 %v1377_v29, %v872_v28 }
 0x261   :  { %v1417_v33 = vpop.f32.mrf.mxu0 }
 0x262   :  { %v1398_v32 = vadd.f32 %v1397_v31, %v1378_v30 }
 0x264   :  { %v1418_v34 = vadd.f32 %v1417_v33, %v1398_v32 }
 0x266   :  { %v1438_v36 = vadd.f32 %v1437_v35, %v1418_v34 }
 0x268   :  { %1484 = vtanh.f32 %v1438_v36 }
 0x26e   :  { %v1485_v37 = vpop.eup %1484 }
 0x26f   :  { %1454 = vst.msk [vmem:[#allocation2 + $0x30] sm:$0xff] %vm1453_vm0, %v1485_v37 }
 0x270   :  { %1465 = dma.vmem_to_hbm [thread:$0]  %s1461_s13, 896, %s1463_s16, [#allocation3]  }
 0x271   :  { %1510 = dma.done.wait [#allocation3], 896  }
 0x272   :  { %1511 = vsyncadd [#allocation3], 4294966400 }
 0x273   :  { %1470 = vsyncpa [#allocation3], 1 }

</bundles_post_ra>
